<compile_context>
chip_gen: v5e
topology: v5e:2x2
jax: 0.10.0
libtpu: 0.0.40
codegen_flags: <defaults>
</compile_context>

<pallas_src>
import functools

import jax
import jax.numpy as jnp
import numpy as np
from jax import lax
from jax.experimental import pallas as pl
from jax.experimental.pallas import tpu as pltpu

# ReccurrentBlock parameters (constant-initialized in the module __init__).
EPS = 10.0
DELTA = 10.0

# Patch features come out ordered (C, KH, KW) == torch OIHW weight flattening.
_PATCH_DN = ("NHWC", "OIHW", "NHWC")


# ----------------------------- Pallas kernels ------------------------------

def _conv_mm_kernel(p_ref, w_ref, b_ref, o_ref, *, fuse_rec, eps, delta):
    """One conv layer as matmul: [rec] -> patches @ W + b -> ReLU."""
    p = p_ref[...]
    if fuse_rec:
        # ReccurrentBlock: dist = floor(dist*eps); dist[dist > delta] = delta
        p = jnp.minimum(jnp.floor(p * eps), delta)
    y = jnp.dot(p, w_ref[...], preferred_element_type=jnp.float32) + b_ref[...]
    o_ref[...] = jnp.maximum(y, 0.0)


def _head_kernel(x_ref, w3_ref, b3_ref, w4_ref, b4_ref, w5_ref, b5_ref, o_ref):
    """conv3 (as matmul) + ReLU + fc1 + ReLU + fc2, fully VMEM-resident."""
    h = jnp.dot(x_ref[...], w3_ref[...], preferred_element_type=jnp.float32) + b3_ref[...]
    h = jnp.maximum(h, 0.0)
    h = jnp.dot(h, w4_ref[...], preferred_element_type=jnp.float32) + b4_ref[...]
    h = jnp.maximum(h, 0.0)
    o_ref[...] = jnp.dot(h, w5_ref[...], preferred_element_type=jnp.float32) + b5_ref[...]


def _fc_head_kernel(x_ref, w4_ref, b4_ref, w5_ref, b5_ref, o_ref):
    """fc1 + ReLU + fc2 fused (general-width fallback)."""
    h = jnp.dot(x_ref[...], w4_ref[...], preferred_element_type=jnp.float32) + b4_ref[...]
    h = jnp.maximum(h, 0.0)
    o_ref[...] = jnp.dot(h, w5_ref[...], preferred_element_type=jnp.float32) + b5_ref[...]


# ------------------------------ kernel wrappers -----------------------------

def conv_matmul_relu(patches, wmat, bias, *, fuse_rec=False, tile_m=512):
    """(M, K) @ (K, O) + b, ReLU.  Grid over M ("parallel") when M is large."""
    m, k = patches.shape
    o = wmat.shape[1]
    tm = m if m <= tile_m else tile_m          # single full block at small M
    return pl.pallas_call(
        functools.partial(_conv_mm_kernel, fuse_rec=fuse_rec, eps=EPS, delta=DELTA),
        out_shape=jax.ShapeDtypeStruct((m, o), jnp.float32),
        grid=(pl.cdiv(m, tm),),
        in_specs=[
            pl.BlockSpec((tm, k), lambda i: (i, 0)),
            pl.BlockSpec((k, o), lambda i: (0, 0)),
            pl.BlockSpec((1, o), lambda i: (0, 0)),
        ],
        out_specs=pl.BlockSpec((tm, o), lambda i: (i, 0)),
        compiler_params=pltpu.CompilerParams(dimension_semantics=("parallel",)),
    )(patches, wmat, bias.reshape(1, o))


def _vmem_params(*weights):
    nbytes = sum(int(np.prod(w.shape)) for w in weights) * 4
    if nbytes > 8 * 1024 * 1024:
        # Large-width configs (hidden_out >= 3136): raise scoped VMEM so the
        # single-block fc1 weight fits (a K-tiled accumulator version would be
        # the better long-term fix for v5e/v7x).
        return pltpu.CompilerParams(vmem_limit_bytes=64 * 1024 * 1024)
    return None


def fused_head(x, w3m, b3, w4, b4, w5, b5):
    n = x.shape[0]
    out = w5.shape[1]
    vmem = pl.BlockSpec(memory_space=pltpu.MemorySpace.VMEM)
    return pl.pallas_call(
        _head_kernel,
        out_shape=jax.ShapeDtypeStruct((n, out), jnp.float32),
        in_specs=[vmem] * 7,
        out_specs=vmem,
        compiler_params=_vmem_params(w3m, w4, w5),
    )(x, w3m, b3.reshape(1, -1), w4, b4.reshape(1, -1), w5, b5.reshape(1, -1))


def fused_fc_head(x, w4, b4, w5, b5):
    n = x.shape[0]
    out = w5.shape[1]
    vmem = pl.BlockSpec(memory_space=pltpu.MemorySpace.VMEM)
    return pl.pallas_call(
        _fc_head_kernel,
        out_shape=jax.ShapeDtypeStruct((n, out), jnp.float32),
        in_specs=[vmem] * 5,
        out_specs=vmem,
        compiler_params=_vmem_params(w4, w5),
    )(x, w4, b4.reshape(1, -1), w5, b5.reshape(1, -1))


# ------------------------------- conv glue ---------------------------------

def _extract_patches(x_nhwc, kh, kw, stride):
    """NHWC -> (N*OH*OW, C*KH*KW) patches (feature order C,KH,KW), one HLO."""
    p = lax.conv_general_dilated_patches(
        x_nhwc, (kh, kw), (stride, stride), "VALID",
        dimension_numbers=_PATCH_DN,
        precision=lax.Precision.HIGHEST)       # exact element copies
    n, oh, ow, f = p.shape
    return p.reshape(n * oh * ow, f), oh, ow


# ------------------------------ full forward -------------------------------

def init_params(key, in_size=1, out_size=12, width=30):
    hidden_out = {30: 64, 50: 576, 60: 1024, 80: 3136, 100: 5184}[width]
    ks = jax.random.split(key, 10)

    def w(k, shape, fan_in):
        return (jax.random.normal(k, shape, jnp.float32) / np.sqrt(fan_in)).astype(jnp.float32)

    return {
        "conv1_w": w(ks[0], (16, in_size, 5, 5), in_size * 25),
        "conv1_b": w(ks[1], (16,), 16),
        "conv2_w": w(ks[2], (32, 16, 5, 5), 16 * 25),
        "conv2_b": w(ks[3], (32,), 32),
        "conv3_w": w(ks[4], (64, 32, 5, 5), 32 * 25),
        "conv3_b": w(ks[5], (64,), 64),
        "fc1_w": w(ks[6], (hidden_out, 1024), hidden_out),
        "fc1_b": w(ks[7], (1024,), 1024),
        "fc2_w": w(ks[8], (1024, out_size), 1024),
        "fc2_b": w(ks[9], (out_size,), out_size),
    }


def forward(params, x):
    n = x.shape[0]
    # One trivial layout change up front; everything stays NHWC afterwards.
    x = jnp.transpose(x, (0, 2, 3, 1))

    # conv1 (ReccurrentBlock fused into the kernel) --------------------------
    w1 = params["conv1_w"]
    o1, _, kh1, kw1 = w1.shape
    p1, oh1, ow1 = _extract_patches(x, kh1, kw1, 2)
    a1 = conv_matmul_relu(p1, w1.reshape(o1, -1).T, params["conv1_b"], fuse_rec=True)
    a1 = a1.reshape(n, oh1, ow1, o1)

    # conv2 -------------------------------------------------------------------
    w2 = params["conv2_w"]
    o2, _, kh2, kw2 = w2.shape
    p2, oh2, ow2 = _extract_patches(a1, kh2, kw2, 2)
    a2 = conv_matmul_relu(p2, w2.reshape(o2, -1).T, params["conv2_b"])
    a2 = a2.reshape(n, oh2, ow2, o2)

    # conv3 + flatten + dropout + fc1 + ReLU + dropout + fc2 ------------------
    # TODO(synk): nn.Dropout is inference-mode identity here; training-mode RNG
    # masking is not implemented in the kernels.
    w3 = params["conv3_w"]
    o3, c3, kh3, kw3 = w3.shape
    oh3 = (oh2 - kh3) // 2 + 1
    ow3 = (ow2 - kw3) // 2 + 1
    if oh3 == 1 and ow3 == 1 and oh2 == kh3 and ow2 == kw3:
        # conv3's single window covers the whole feature map (width=30), so no
        # patch op is needed: reorder conv3 weight rows to NHWC (KH,KW,C) once
        # and fuse conv3 + fc1 + fc2 in a single kernel.
        w3m = jnp.transpose(w3, (2, 3, 1, 0)).reshape(kh3 * kw3 * c3, o3)
        x3 = a2.reshape(n, oh2 * ow2 * o2)
        return fused_head(x3, w3m, params["conv3_b"],
                          params["fc1_w"], params["fc1_b"],
                          params["fc2_w"], params["fc2_b"])

    # General widths: separate conv3 matmul kernel, NCHW flatten (matches the
    # torch .view ordering), then the fused fc1+fc2 kernel.
    p3, oh3, ow3 = _extract_patches(a2, kh3, kw3, 2)
    a3 = conv_matmul_relu(p3, w3.reshape(o3, -1).T, params["conv3_b"])
    a3 = a3.reshape(n, oh3, ow3, o3).transpose(0, 3, 1, 2).reshape(n, -1)
    return fused_fc_head(a3, params["fc1_w"], params["fc1_b"],
                         params["fc2_w"], params["fc2_b"])


# pure-JAX reference for correctness check
def reference(params, x):
    x = jnp.minimum(jnp.floor(x * EPS), DELTA)

    def conv(x, w, b):
        y = lax.conv_general_dilated(
            x, w, (2, 2), "VALID",
            dimension_numbers=("NCHW", "OIHW", "NCHW"),
            precision=lax.Precision.HIGHEST)
        return jax.nn.relu(y + b[None, :, None, None])

    x = conv(x, params["conv1_w"], params["conv1_b"])
    x = conv(x, params["conv2_w"], params["conv2_b"])
    x = conv(x, params["conv3_w"], params["conv3_b"])
    x = x.reshape(x.shape[0], -1)
    x = jax.nn.relu(jnp.dot(x, params["fc1_w"], precision=lax.Precision.HIGHEST)
                    + params["fc1_b"])
    return jnp.dot(x, params["fc2_w"], precision=lax.Precision.HIGHEST) + params["fc2_b"]


if __name__ == "__main__":
    key = jax.random.PRNGKey(0)
    k_param, k_x = jax.random.split(key)

    # width=30 branch of the module: input (N, 1, 30, 30) -> hidden_out = 64
    params = init_params(k_param, in_size=1, out_size=12, width=30)
    x = jax.random.normal(k_x, (2, 1, 30, 30), jnp.float32)

    fwd = jax.jit(forward)
    out = jax.block_until_ready(fwd(params, x))
    ref = jax.block_until_ready(reference(params, x))

    assert out.shape == (2, 12), out.shape
    max_err = np.max(np.abs(np.asarray(out) - np.asarray(ref)))
    assert np.allclose(np.asarray(out), np.asarray(ref), rtol=1e-4, atol=1e-3), max_err
    print("KERNEL_OK")
</pallas_src>

<mosaic_0001>
module attributes {stable_mosaic.version = 11 : i64} {
  func.func @_conv_mm_kernel(%arg0: i32, %arg1: memref<338x25xf32, #tpu.memory_space<vmem>>, %arg2: memref<25x16xf32, #tpu.memory_space<vmem>>, %arg3: memref<1x16xf32, #tpu.memory_space<vmem>>, %arg4: memref<338x16xf32, #tpu.memory_space<vmem>>) attributes {dimension_semantics = [#tpu.dimension_semantics<parallel>], iteration_bounds = array<i64: 1>, scalar_prefetch = 0 : i64, scratch_operands = 0 : i64, tpu.core_type = #tpu.core_type<tc>, window_params = [{transform_indices = @transform_0, window_bounds = array<i64: 338, 25>}, {pipeline_mode = #tpu.pipeline_mode<synchronous>, transform_indices = @transform_1, window_bounds = array<i64: 25, 16>}, {pipeline_mode = #tpu.pipeline_mode<synchronous>, transform_indices = @transform_2, window_bounds = array<i64: 1, 16>}, {transform_indices = @transform_3, window_bounds = array<i64: 338, 16>}]} {
    %c0 = arith.constant 0 : index
    %c0_0 = arith.constant 0 : index
    %0 = vector.load %arg1[%c0, %c0_0] : memref<338x25xf32, #tpu.memory_space<vmem>>, vector<338x25xf32>
    %cst = arith.constant 1.000000e+01 : f32
    %1 = vector.broadcast %cst : f32 to vector<338x25xf32>
    %2 = arith.mulf %0, %1 : vector<338x25xf32>
    %3 = math.floor %2 : vector<338x25xf32>
    %cst_1 = arith.constant 1.000000e+01 : f32
    %4 = vector.broadcast %cst_1 : f32 to vector<338x25xf32>
    %5 = arith.minimumf %3, %4 : vector<338x25xf32>
    %c0_2 = arith.constant 0 : index
    %c0_3 = arith.constant 0 : index
    %6 = vector.load %arg2[%c0_2, %c0_3] : memref<25x16xf32, #tpu.memory_space<vmem>>, vector<25x16xf32>
    %cst_4 = arith.constant dense<0.000000e+00> : vector<338x16xf32>
    %7 = tpu.matmul %5, %6, %cst_4 {dimension_numbers = #tpu.dot_dimension_numbers<[1], [0], [0], [1], [0, 0, 1, 1], [], []>} : vector<338x25xf32>, vector<25x16xf32>, vector<338x16xf32> -> vector<338x16xf32>
    %c0_5 = arith.constant 0 : index
    %c0_6 = arith.constant 0 : index
    %8 = vector.load %arg3[%c0_5, %c0_6] : memref<1x16xf32, #tpu.memory_space<vmem>>, vector<1x16xf32>
    %9 = vector.broadcast %8 : vector<1x16xf32> to vector<338x16xf32>
    %10 = arith.addf %7, %9 : vector<338x16xf32>
    %cst_7 = arith.constant 0.000000e+00 : f32
    %11 = vector.broadcast %cst_7 : f32 to vector<338x16xf32>
    %12 = arith.maximumf %10, %11 : vector<338x16xf32>
    %c0_8 = arith.constant 0 : index
    %c0_9 = arith.constant 0 : index
    %13 = vector.load %arg4[%c0_8, %c0_9] : memref<338x16xf32, #tpu.memory_space<vmem>>, vector<338x16xf32>
    tpu.vector_store %arg4[%c0_8, %c0_9], %12 {strides = array<i32>} : memref<338x16xf32, #tpu.memory_space<vmem>>, vector<338x16xf32>,
    return
  }
  func.func @transform_0(%arg0: i32) -> (i32, i32) {
    %c0_i32 = arith.constant 0 : i32
    %c0_i32_0 = arith.constant 0 : i32
    return %arg0, %c0_i32 : i32, i32
  }
  func.func @transform_1(%arg0: i32) -> (i32, i32) {
    %c0_i32 = arith.constant 0 : i32
    %c0_i32_0 = arith.constant 0 : i32
    %c0_i32_1 = arith.constant 0 : i32
    return %c0_i32, %c0_i32_0 : i32, i32
  }
  func.func @transform_2(%arg0: i32) -> (i32, i32) {
    %c0_i32 = arith.constant 0 : i32
    %c0_i32_0 = arith.constant 0 : i32
    %c0_i32_1 = arith.constant 0 : i32
    return %c0_i32, %c0_i32_0 : i32, i32
  }
  func.func @transform_3(%arg0: i32) -> (i32, i32) {
    %c0_i32 = arith.constant 0 : i32
    %c0_i32_0 = arith.constant 0 : i32
    return %arg0, %c0_i32 : i32, i32
  }
}

module attributes {stable_mosaic.version = 11 : i64} {
  func.func @_conv_mm_kernel(%arg0: i32, %arg1: memref<50x400xf32, #tpu.memory_space<vmem>>, %arg2: memref<400x32xf32, #tpu.memory_space<vmem>>, %arg3: memref<1x32xf32, #tpu.memory_space<vmem>>, %arg4: memref<50x32xf32, #tpu.memory_space<vmem>>) attributes {dimension_semantics = [#tpu.dimension_semantics<parallel>], iteration_bounds = array<i64: 1>, scalar_prefetch = 0 : i64, scratch_operands = 0 : i64, tpu.core_type = #tpu.core_type<tc>, window_params = [{transform_indices = @transform_0, window_bounds = array<i64: 50, 400>}, {pipeline_mode = #tpu.pipeline_mode<synchronous>, transform_indices = @transform_1, window_bounds = array<i64: 400, 32>}, {pipeline_mode = #tpu.pipeline_mode<synchronous>, transform_indices = @transform_2, window_bounds = array<i64: 1, 32>}, {transform_indices = @transform_3, window_bounds = array<i64: 50, 32>}]} {
    %c0 = arith.constant 0 : index
    %c0_0 = arith.constant 0 : index
    %0 = vector.load %arg1[%c0, %c0_0] : memref<50x400xf32, #tpu.memory_space<vmem>>, vector<50x400xf32>
    %c0_1 = arith.constant 0 : index
    %c0_2 = arith.constant 0 : index
    %1 = vector.load %arg2[%c0_1, %c0_2] : memref<400x32xf32, #tpu.memory_space<vmem>>, vector<400x32xf32>
    %cst = arith.constant dense<0.000000e+00> : vector<50x32xf32>
    %2 = tpu.matmul %0, %1, %cst {dimension_numbers = #tpu.dot_dimension_numbers<[1], [0], [0], [1], [0, 0, 1, 1], [], []>} : vector<50x400xf32>, vector<400x32xf32>, vector<50x32xf32> -> vector<50x32xf32>
    %c0_3 = arith.constant 0 : index
    %c0_4 = arith.constant 0 : index
    %3 = vector.load %arg3[%c0_3, %c0_4] : memref<1x32xf32, #tpu.memory_space<vmem>>, vector<1x32xf32>
    %4 = vector.broadcast %3 : vector<1x32xf32> to vector<50x32xf32>
    %5 = arith.addf %2, %4 : vector<50x32xf32>
    %cst_5 = arith.constant 0.000000e+00 : f32
    %6 = vector.broadcast %cst_5 : f32 to vector<50x32xf32>
    %7 = arith.maximumf %5, %6 : vector<50x32xf32>
    %c0_6 = arith.constant 0 : index
    %c0_7 = arith.constant 0 : index
    %8 = vector.load %arg4[%c0_6, %c0_7] : memref<50x32xf32, #tpu.memory_space<vmem>>, vector<50x32xf32>
    tpu.vector_store %arg4[%c0_6, %c0_7], %7 {strides = array<i32>} : memref<50x32xf32, #tpu.memory_space<vmem>>, vector<50x32xf32>,
    return
  }
  func.func @transform_0(%arg0: i32) -> (i32, i32) {
    %c0_i32 = arith.constant 0 : i32
    %c0_i32_0 = arith.constant 0 : i32
    return %arg0, %c0_i32 : i32, i32
  }
  func.func @transform_1(%arg0: i32) -> (i32, i32) {
    %c0_i32 = arith.constant 0 : i32
    %c0_i32_0 = arith.constant 0 : i32
    %c0_i32_1 = arith.constant 0 : i32
    return %c0_i32, %c0_i32_0 : i32, i32
  }
  func.func @transform_2(%arg0: i32) -> (i32, i32) {
    %c0_i32 = arith.constant 0 : i32
    %c0_i32_0 = arith.constant 0 : i32
    %c0_i32_1 = arith.constant 0 : i32
    return %c0_i32, %c0_i32_0 : i32, i32
  }
  func.func @transform_3(%arg0: i32) -> (i32, i32) {
    %c0_i32 = arith.constant 0 : i32
    %c0_i32_0 = arith.constant 0 : i32
    return %arg0, %c0_i32 : i32, i32
  }
}

module attributes {stable_mosaic.version = 11 : i64} {
  func.func @_head_kernel(%arg0: memref<2x800xf32, #tpu.memory_space<vmem>>, %arg1: memref<800x64xf32, #tpu.memory_space<vmem>>, %arg2: memref<1x64xf32, #tpu.memory_space<vmem>>, %arg3: memref<64x1024xf32, #tpu.memory_space<vmem>>, %arg4: memref<1x1024xf32, #tpu.memory_space<vmem>>, %arg5: memref<1024x12xf32, #tpu.memory_space<vmem>>, %arg6: memref<1x12xf32, #tpu.memory_space<vmem>>, %arg7: memref<2x12xf32, #tpu.memory_space<vmem>>) attributes {dimension_semantics = [], scalar_prefetch = 0 : i64, scratch_operands = 0 : i64, tpu.core_type = #tpu.core_type<tc>} {
    %c0 = arith.constant 0 : index
    %c0_0 = arith.constant 0 : index
    %0 = vector.load %arg0[%c0, %c0_0] : memref<2x800xf32, #tpu.memory_space<vmem>>, vector<2x800xf32>
    %c0_1 = arith.constant 0 : index
    %c0_2 = arith.constant 0 : index
    %1 = vector.load %arg1[%c0_1, %c0_2] : memref<800x64xf32, #tpu.memory_space<vmem>>, vector<800x64xf32>
    %cst = arith.constant dense<0.000000e+00> : vector<2x64xf32>
    %2 = tpu.matmul %0, %1, %cst {dimension_numbers = #tpu.dot_dimension_numbers<[1], [0], [0], [1], [0, 0, 1, 1], [], []>} : vector<2x800xf32>, vector<800x64xf32>, vector<2x64xf32> -> vector<2x64xf32>
    %c0_3 = arith.constant 0 : index
    %c0_4 = arith.constant 0 : index
    %3 = vector.load %arg2[%c0_3, %c0_4] : memref<1x64xf32, #tpu.memory_space<vmem>>, vector<1x64xf32>
    %4 = vector.broadcast %3 : vector<1x64xf32> to vector<2x64xf32>
    %5 = arith.addf %2, %4 : vector<2x64xf32>
    %cst_5 = arith.constant 0.000000e+00 : f32
    %6 = vector.broadcast %cst_5 : f32 to vector<2x64xf32>
    %7 = arith.maximumf %5, %6 : vector<2x64xf32>
    %c0_6 = arith.constant 0 : index
    %c0_7 = arith.constant 0 : index
    %8 = vector.load %arg3[%c0_6, %c0_7] : memref<64x1024xf32, #tpu.memory_space<vmem>>, vector<64x1024xf32>
    %cst_8 = arith.constant dense<0.000000e+00> : vector<2x1024xf32>
    %9 = tpu.matmul %7, %8, %cst_8 {dimension_numbers = #tpu.dot_dimension_numbers<[1], [0], [0], [1], [0, 0, 1, 1], [], []>} : vector<2x64xf32>, vector<64x1024xf32>, vector<2x1024xf32> -> vector<2x1024xf32>
    %c0_9 = arith.constant 0 : index
    %c0_10 = arith.constant 0 : index
    %10 = vector.load %arg4[%c0_9, %c0_10] : memref<1x1024xf32, #tpu.memory_space<vmem>>, vector<1x1024xf32>
    %11 = vector.broadcast %10 : vector<1x1024xf32> to vector<2x1024xf32>
    %12 = arith.addf %9, %11 : vector<2x1024xf32>
    %cst_11 = arith.constant 0.000000e+00 : f32
    %13 = vector.broadcast %cst_11 : f32 to vector<2x1024xf32>
    %14 = arith.maximumf %12, %13 : vector<2x1024xf32>
    %c0_12 = arith.constant 0 : index
    %c0_13 = arith.constant 0 : index
    %15 = vector.load %arg5[%c0_12, %c0_13] : memref<1024x12xf32, #tpu.memory_space<vmem>>, vector<1024x12xf32>
    %cst_14 = arith.constant dense<0.000000e+00> : vector<2x12xf32>
    %16 = tpu.matmul %14, %15, %cst_14 {dimension_numbers = #tpu.dot_dimension_numbers<[1], [0], [0], [1], [0, 0, 1, 1], [], []>} : vector<2x1024xf32>, vector<1024x12xf32>, vector<2x12xf32> -> vector<2x12xf32>
    %c0_15 = arith.constant 0 : index
    %c0_16 = arith.constant 0 : index
    %17 = vector.load %arg6[%c0_15, %c0_16] : memref<1x12xf32, #tpu.memory_space<vmem>>, vector<1x12xf32>
    %18 = vector.broadcast %17 : vector<1x12xf32> to vector<2x12xf32>
    %19 = arith.addf %16, %18 : vector<2x12xf32>
    %c0_17 = arith.constant 0 : index
    %c0_18 = arith.constant 0 : index
    %20 = vector.load %arg7[%c0_17, %c0_18] : memref<2x12xf32, #tpu.memory_space<vmem>>, vector<2x12xf32>
    tpu.vector_store %arg7[%c0_17, %c0_18], %19 {strides = array<i32>} : memref<2x12xf32, #tpu.memory_space<vmem>>, vector<2x12xf32>,
    return
  }
}

</mosaic_0001>

<bundles_post_ra>
// kernel: forward.3
= control target key start
LH: loop header
LB: loop body
LE: loop exit
PB: predicated region body
PF: predicated region fallthrough
CT: control target
= control target key end

     0   :  { %vm324_vm0 = vcmask 1040384   ;;  %vm194_vm1 = vcmask 203776   ;;  %vm517_vm2 = vcmask 130048   ;;  %vm560_vm3 = vcmask 123904   ;;  %s1046_s1 = inlined_call_operand.vmem [shape: f32[25,16], index: 1, kind: input, shape index: {}]   ;;  %s1047_s0 = inlined_call_operand.vmem [shape: f32[338,25], index: 0, kind: input, shape index: {}]   ;;  %s1048_s2 = inlined_call_operand.vmem [shape: f32[1,16], index: 2, kind: input, shape index: {}]   ;;  %s1049_s3 = inlined_call_operand.vmem [shape: f32[338,16], index: 3, kind: output, shape index: {}]  }
   0x1   :  { %v189_v0 = vld [vmem:[%s1046_s1 + $0x18] sm:$0x1]  ;;  %v188_v1 = vld [vmem:[%s1046_s1 + $0x10] sm:$0xff]  ;;  %v187_v2 = vld [vmem:[%s1046_s1 + $0x8] sm:$0xff] }
   0x2   :  { %611 = vmatpush.msk.msra.mxu2 %vm324_vm0, %v189_v0  ;;  %566 = vmatpush.msk.msra.mxu0 %vm324_vm0, %v189_v0  ;;  %v36_v3 = vld [vmem:[%s1047_s0 + $0xb0] sm:$0xff]  ;;  %v14_v4 = vld [vmem:[%s1047_s0] sm:$0xff]  ;;  %v25_v7 = vld [vmem:[%s1047_s0 + $0x58] sm:$0xff] }
   0x3   :  { %610 = vmatpush.msk.msra.mxu1 %vm324_vm0, %v189_v0  ;;  %v79_v5 = vmul.f32 10.0, %v36_v3  ;;  %612 = vmatpush.msk.msra.mxu3 %vm324_vm0, %v189_v0  ;;  %v57_v6 = vmul.f32 10.0, %v14_v4  ;;  %v37_v8 = vld [vmem:[%s1047_s0 + $0xb8] sm:$0xff]  ;;  %v47_v9 = vld [vmem:[%s1047_s0 + $0x108] sm:$0xff]  ;;  %v68_v10 = vmul.f32 10.0, %v25_v7  ;;  %v26_v13 = vld [vmem:[%s1047_s0 + $0x60] sm:$0xff] }
   0x4   :  { %614 = vmatpush.msra.mxu2 %v188_v1  ;;  %341 = vmatpush.msra.mxu0 %v188_v1  ;;  %v90_v11 = vmul.f32 10.0, %v47_v9  ;;  %v15_v12 = vld [vmem:[%s1047_s0 + $0x8] sm:$0xff]  ;;  %v186_v14 = vld [vmem:[%s1046_s1] sm:$0xff]  ;;  %v80_v17 = vmul.f32 10.0, %v37_v8  ;;  %v69_v21 = vmul.f32 10.0, %v26_v13  ;;  %v48_v22 = vld [vmem:[%s1047_s0 + $0x110] sm:$0xff] }
   0x5   :  { %v122_v15 = vfloor.f32 %v79_v5  ;;  %613 = vmatpush.msra.mxu1 %v188_v1  ;;  %615 = vmatpush.msra.mxu3 %v188_v1  ;;  %v100_v16 = vfloor.f32 %v57_v6  ;;  %v111_v18 = vfloor.f32 %v68_v10  ;;  %v58_v20 = vmul.f32 10.0, %v15_v12  ;;  %v38_v31 = vld [vmem:[%s1047_s0 + $0xc0] sm:$0xff]  ;;  %v16_v32 = vld [vmem:[%s1047_s0 + $0x10] sm:$0xff]  ;;  %v27_v33 = vld [vmem:[%s1047_s0 + $0x68] sm:$0xff] }
   0x6   :  { %617 = vmatpush.msra.mxu2 %v187_v2  ;;  %342 = vmatpush.msra.mxu0 %v187_v2  ;;  %v133_v19 = vfloor.f32 %v90_v11  ;;  %v123_v27 = vfloor.f32 %v80_v17  ;;  %v91_v28 = vmul.f32 10.0, %v48_v22  ;;  %v112_v30 = vfloor.f32 %v69_v21  ;;  %v49_v37 = vld [vmem:[%s1047_s0 + $0x118] sm:$0xff]  ;;  %v39_v47 = vld [vmem:[%s1047_s0 + $0xc8] sm:$0xff]  ;;  %v28_v49 = vld [vmem:[%s1047_s0 + $0x70] sm:$0xff] }
   0x7   :  { %v165_v23 = vmin.f32 %v122_v15, 10.0  ;;  %616 = vmatpush.msra.mxu1 %v187_v2  ;;  %618 = vmatpush.msra.mxu3 %v187_v2  ;;  %v143_v24 = vmin.f32 %v100_v16, 10.0  ;;  %v154_v25 = vmin.f32 %v111_v18, 10.0  ;;  %v101_v29 = vfloor.f32 %v58_v20  ;;  %v17_v48 = vld [vmem:[%s1047_s0 + $0x18] sm:$0xff]  ;;  %v50_v53 = vld [vmem:[%s1047_s0 + $0x120] sm:$0xff]  ;;  %v40_v63 = vld [vmem:[%s1047_s0 + $0xd0] sm:$0xff] }
   0x8   :  { %620 = vmatpush.msra.mxu2 %v186_v14  ;;  %343 = vmatpush.msra.mxu0 %v186_v14  ;;  %v176_v26 = vmin.f32 %v133_v19, 10.0  ;;  %v134_v34 = vfloor.f32 %v91_v28  ;;  %v166_v35 = vmin.f32 %v123_v27, 10.0  ;;  %v81_v36 = vmul.f32 10.0, %v38_v31  ;;  %v18_v0 = vld [vmem:[%s1047_s0 + $0x20] sm:$0xff]  ;;  %v29_v1 = vld [vmem:[%s1047_s0 + $0x78] sm:$0xff]  ;;  %v51_v5 = vld [vmem:[%s1047_s0 + $0x128] sm:$0xff] }
   0x9   :  { %589 = vmatmul.msk.f32.vlgmr.msra.gmra.mxu2 %vm194_vm1, %v165_v23  ;;  %619 = vmatpush.msra.mxu1 %v186_v14  ;;  %v144_v38 = vmin.f32 %v101_v29, 10.0  ;;  %v155_v39 = vmin.f32 %v112_v30, 10.0  ;;  %v59_v40 = vmul.f32 10.0, %v16_v32  ;;  %v70_v41 = vmul.f32 10.0, %v27_v33  ;;  %v41_v15 = vld [vmem:[%s1047_s0 + $0xd8] sm:$0xff]  ;;  %v19_v16 = vld [vmem:[%s1047_s0 + $0x28] sm:$0xff] }
   0xa   :  { %567 = vmatmul.msk.f32.vlgmr.msra.gmra.mxu0 %vm194_vm1, %v143_v24  ;;  %578 = vmatmul.msk.f32.vlgmr.msra.gmra.mxu1 %vm194_vm1, %v154_v25  ;;  %v177_v42 = vmin.f32 %v134_v34, 10.0  ;;  %v92_v43 = vmul.f32 10.0, %v49_v37  ;;  %v124_v44 = vfloor.f32 %v81_v36  ;;  %v82_v52 = vmul.f32 10.0, %v39_v47  ;;  %v30_v17 = vld [vmem:[%s1047_s0 + $0x80] sm:$0xff]  ;;  %v52_v21 = vld [vmem:[%s1047_s0 + $0x130] sm:$0xff]  ;;  %v31_v33 = vld [vmem:[%s1047_s0 + $0x88] sm:$0xff] }
   0xb   :  { %621 = vmatpush.msra.mxu3 %v186_v14  ;;  %v102_v45 = vfloor.f32 %v59_v40  ;;  %v113_v46 = vfloor.f32 %v70_v41  ;;  %v60_v56 = vmul.f32 10.0, %v17_v48  ;;  %v71_v57 = vmul.f32 10.0, %v28_v49  ;;  %v42_v31 = vld [vmem:[%s1047_s0 + $0xe0] sm:$0xff]  ;;  %v20_v32 = vld [vmem:[%s1047_s0 + $0x30] sm:$0xff]  ;;  %v53_v37 = vld [vmem:[%s1047_s0 + $0x138] sm:$0xff] }
   0xc   :  { %600 = vmatmul.msk.f32.vlgmr.msra.gmra.mxu3 %vm194_vm1, %v176_v26  ;;  %v135_v50 = vfloor.f32 %v92_v43  ;;  %v167_v51 = vmin.f32 %v124_v44, 10.0  ;;  %v93_v59 = vmul.f32 10.0, %v50_v53  ;;  %v125_v60 = vfloor.f32 %v82_v52  ;;  %v43_v47 = vld [vmem:[%s1047_s0 + $0xe8] sm:$0xff]  ;;  %v21_v48 = vld [vmem:[%s1047_s0 + $0x38] sm:$0xff]  ;;  %v32_v49 = vld [vmem:[%s1047_s0 + $0x90] sm:$0xff] }
   0xd   :  { %v145_v54 = vmin.f32 %v102_v45, 10.0  ;;  %v156_v55 = vmin.f32 %v113_v46, 10.0  ;;  %v103_v61 = vfloor.f32 %v60_v56  ;;  %v114_v62 = vfloor.f32 %v71_v57  ;;  %v54_v53 = vld [vmem:[%s1047_s0 + $0x140] sm:$0xff] }
   0xe   :  { %v178_v58 = vmin.f32 %v135_v50, 10.0  ;;  %v136_v2 = vfloor.f32 %v93_v59  ;;  %v168_v3 = vmin.f32 %v125_v60, 10.0  ;;  %v83_v4 = vmul.f32 10.0, %v40_v63  ;;  %v44_v63 = vld [vmem:[%s1047_s0 + $0xf0] sm:$0xff] }
   0xf   :  { %v146_v6 = vmin.f32 %v103_v61, 10.0  ;;  %v157_v7 = vmin.f32 %v114_v62, 10.0  ;;  %v61_v8 = vmul.f32 10.0, %v18_v0  ;;  %v72_v9 = vmul.f32 10.0, %v29_v1  ;;  %v22_v0 = vld [vmem:[%s1047_s0 + $0x40] sm:$0xff]  ;;  %v33_v1 = vld [vmem:[%s1047_s0 + $0x98] sm:$0xff] }
  0x10   :  { %v179_v10 = vmin.f32 %v136_v2, 10.0  ;;  %v94_v11 = vmul.f32 10.0, %v51_v5  ;;  %v126_v12 = vfloor.f32 %v83_v4  ;;  %v84_v20 = vmul.f32 10.0, %v41_v15  ;;  %v55_v5 = vld [vmem:[%s1047_s0 + $0x148] sm:$0xff]  ;;  %v45_v15 = vld [vmem:[%s1047_s0 + $0xf8] sm:$0xff] }
  0x11   :  { %590 = vmatmul.msk.f32.gmra.mxu2 %vm194_vm1, %v166_v35  ;;  %v104_v13 = vfloor.f32 %v61_v8  ;;  %v115_v14 = vfloor.f32 %v72_v9  ;;  %v62_v24 = vmul.f32 10.0, %v19_v16  ;;  %v73_v25 = vmul.f32 10.0, %v30_v17  ;;  %v23_v16 = vld [vmem:[%s1047_s0 + $0x48] sm:$0xff]  ;;  %v34_v17 = vld [vmem:[%s1047_s0 + $0xa0] sm:$0xff] }
  0x12   :  { %568 = vmatmul.msk.f32.gmra.mxu0 %vm194_vm1, %v144_v38  ;;  %579 = vmatmul.msk.f32.gmra.mxu1 %vm194_vm1, %v155_v39  ;;  %v137_v18 = vfloor.f32 %v94_v11  ;;  %v169_v19 = vmin.f32 %v126_v12, 10.0  ;;  %v95_v27 = vmul.f32 10.0, %v52_v21  ;;  %v127_v28 = vfloor.f32 %v84_v20  ;;  %v56_v21 = vld [vmem:[%s1047_s0 + $0x150] sm:$0x3] }
  0x13   :  { %v147_v22 = vmin.f32 %v104_v13, 10.0  ;;  %v158_v23 = vmin.f32 %v115_v14, 10.0  ;;  %v105_v29 = vfloor.f32 %v62_v24  ;;  %v116_v30 = vfloor.f32 %v73_v25 }
  0x14   :  { %601 = vmatmul.msk.f32.gmra.mxu3 %vm194_vm1, %v177_v42  ;;  %v180_v26 = vmin.f32 %v137_v18, 10.0  ;;  %v138_v34 = vfloor.f32 %v95_v27  ;;  %v170_v35 = vmin.f32 %v127_v28, 10.0  ;;  %v85_v36 = vmul.f32 10.0, %v42_v31  ;;  %v46_v31 = vld [vmem:[%s1047_s0 + $0x100] sm:$0xff] }
  0x15   :  { %v148_v38 = vmin.f32 %v105_v29, 10.0  ;;  %v159_v39 = vmin.f32 %v116_v30, 10.0  ;;  %v63_v40 = vmul.f32 10.0, %v20_v32  ;;  %v74_v41 = vmul.f32 10.0, %v31_v33  ;;  %v24_v32 = vld [vmem:[%s1047_s0 + $0x50] sm:$0xff]  ;;  %v35_v33 = vld [vmem:[%s1047_s0 + $0xa8] sm:$0xff] }
  0x16   :  { %v181_v42 = vmin.f32 %v138_v34, 10.0  ;;  %v96_v43 = vmul.f32 10.0, %v53_v37  ;;  %v128_v44 = vfloor.f32 %v85_v36  ;;  %v86_v52 = vmul.f32 10.0, %v43_v47 }
  0x17   :  { %v106_v45 = vfloor.f32 %v63_v40  ;;  %v117_v46 = vfloor.f32 %v74_v41  ;;  %v64_v56 = vmul.f32 10.0, %v21_v48  ;;  %v75_v57 = vmul.f32 10.0, %v32_v49  ;;  %v830_v48 = vld [vmem:[%s1048_s2] ss:$0 sm:$0xff] }
  0x18   :  { %v139_v50 = vfloor.f32 %v96_v43  ;;  %v97_v59 = vmul.f32 10.0, %v54_v53  ;;  %v129_v60 = vfloor.f32 %v86_v52  ;;  %v87_v4 = vmul.f32 10.0, %v44_v63 }
  0x19   :  { %591 = vmatmul.msk.f32.gmra.mxu2 %vm194_vm1, %v167_v51  ;;  %v171_v51 = vmin.f32 %v128_v44, 10.0  ;;  %v107_v61 = vfloor.f32 %v64_v56  ;;  %v118_v62 = vfloor.f32 %v75_v57  ;;  %v65_v8 = vmul.f32 10.0, %v22_v0 }
  0x1a   :  { %569 = vmatmul.msk.f32.gmra.mxu0 %vm194_vm1, %v145_v54  ;;  %580 = vmatmul.msk.f32.gmra.mxu1 %vm194_vm1, %v156_v55  ;;  %v149_v54 = vmin.f32 %v106_v45, 10.0  ;;  %v160_v55 = vmin.f32 %v117_v46, 10.0  ;;  %v140_v2 = vfloor.f32 %v97_v59  ;;  %v76_v9 = vmul.f32 10.0, %v33_v1 }
  0x1b   :  { %v98_v11 = vmul.f32 10.0, %v55_v5  ;;  %v130_v12 = vfloor.f32 %v87_v4  ;;  %v108_v13 = vfloor.f32 %v65_v8  ;;  %v88_v20 = vmul.f32 10.0, %v45_v15 }
  0x1c   :  { %602 = vmatmul.msk.f32.gmra.mxu3 %vm194_vm1, %v178_v58  ;;  %v182_v58 = vmin.f32 %v139_v50, 10.0  ;;  %v119_v14 = vfloor.f32 %v76_v9  ;;  %v66_v24 = vmul.f32 10.0, %v23_v16  ;;  %v77_v25 = vmul.f32 10.0, %v34_v17 }
  0x1d   :  { %v141_v18 = vfloor.f32 %v98_v11  ;;  %v99_v27 = vmul.f32 10.0, %v56_v21  ;;  %v131_v28 = vfloor.f32 %v88_v20  ;;  %v89_v36 = vmul.f32 10.0, %v46_v31 }
  0x1e   :  { %v109_v29 = vfloor.f32 %v66_v24  ;;  %v120_v30 = vfloor.f32 %v77_v25  ;;  %v78_v40 = vmul.f32 10.0, %v35_v33 }
  0x1f   :  { %v142_v34 = vfloor.f32 %v99_v27 }
  0x20   :  { %v152_v37 = vmin.f32 %v109_v29, 10.0  ;;  %v121_v44 = vfloor.f32 %v78_v40 }
  0x21   :  { %592 = vmatmul.msk.f32.gmra.mxu2 %vm194_vm1, %v168_v3  ;;  %v172_v3 = vmin.f32 %v129_v60, 10.0  ;;  %v185_v41 = vmin.f32 %v142_v34, 10.0 }
  0x22   :  { %570 = vmatmul.msk.f32.gmra.mxu0 %vm194_vm1, %v146_v6  ;;  %581 = vmatmul.msk.f32.gmra.mxu1 %vm194_vm1, %v157_v7  ;;  %v150_v6 = vmin.f32 %v107_v61, 10.0  ;;  %v161_v7 = vmin.f32 %v118_v62, 10.0  ;;  %v164_v47 = vmin.f32 %v121_v44, 10.0 }
  0x24   :  { %603 = vmatmul.msk.f32.gmra.mxu3 %vm194_vm1, %v179_v10  ;;  %v183_v10 = vmin.f32 %v140_v2, 10.0 }
  0x29   :  { %593 = vmatmul.msk.f32.gmra.mxu2 %vm194_vm1, %v169_v19  ;;  %v173_v19 = vmin.f32 %v130_v12, 10.0 }
  0x2a   :  { %571 = vmatmul.msk.f32.gmra.mxu0 %vm194_vm1, %v147_v22  ;;  %582 = vmatmul.msk.f32.gmra.mxu1 %vm194_vm1, %v158_v23  ;;  %v151_v22 = vmin.f32 %v108_v13, 10.0  ;;  %v162_v23 = vmin.f32 %v119_v14, 10.0 }
  0x2c   :  { %604 = vmatmul.msk.f32.gmra.mxu3 %vm194_vm1, %v180_v26  ;;  %v184_v26 = vmin.f32 %v141_v18, 10.0 }
  0x31   :  { %594 = vmatmul.msk.f32.gmra.mxu2 %vm194_vm1, %v170_v35  ;;  %v174_v35 = vmin.f32 %v131_v28, 10.0 }
  0x32   :  { %572 = vmatmul.msk.f32.gmra.mxu0 %vm194_vm1, %v148_v38  ;;  %583 = vmatmul.msk.f32.gmra.mxu1 %vm194_vm1, %v159_v39  ;;  %v163_v38 = vmin.f32 %v120_v30, 10.0  ;;  %v67_v39 = vmul.f32 10.0, %v24_v32 }
  0x34   :  { %605 = vmatmul.msk.f32.gmra.mxu3 %vm194_vm1, %v181_v42  ;;  %v132_v42 = vfloor.f32 %v89_v36  ;;  %v110_v43 = vfloor.f32 %v67_v39 }
  0x36   :  { %v175_v45 = vmin.f32 %v132_v42, 10.0  ;;  %v153_v46 = vmin.f32 %v110_v43, 10.0 }
  0x39   :  { %595 = vmatmul.msk.f32.gmra.mxu2 %vm194_vm1, %v171_v51 }
  0x3a   :  { %573 = vmatmul.msk.f32.gmra.mxu0 %vm194_vm1, %v149_v54  ;;  %584 = vmatmul.msk.f32.gmra.mxu1 %vm194_vm1, %v160_v55 }
  0x3c   :  { %606 = vmatmul.msk.f32.gmra.mxu3 %vm194_vm1, %v182_v58 }
  0x41   :  { %596 = vmatmul.msk.f32.gmra.mxu2 %vm194_vm1, %v172_v3 }
  0x42   :  { %574 = vmatmul.msk.f32.gmra.mxu0 %vm194_vm1, %v150_v6  ;;  %585 = vmatmul.msk.f32.gmra.mxu1 %vm194_vm1, %v161_v7 }
  0x44   :  { %607 = vmatmul.msk.f32.gmra.mxu3 %vm194_vm1, %v183_v10 }
  0x49   :  { %597 = vmatmul.msk.f32.gmra.mxu2 %vm194_vm1, %v173_v19 }
  0x4a   :  { %575 = vmatmul.msk.f32.gmra.mxu0 %vm194_vm1, %v151_v22  ;;  %586 = vmatmul.msk.f32.gmra.mxu1 %vm194_vm1, %v162_v23 }
  0x4c   :  { %608 = vmatmul.msk.f32.gmra.mxu3 %vm194_vm1, %v184_v26 }
  0x51   :  { %598 = vmatmul.msk.f32.gmra.mxu2 %vm194_vm1, %v174_v35 }
  0x52   :  { %576 = vmatmul.msk.f32.gmra.mxu0 %vm194_vm1, %v152_v37  ;;  %587 = vmatmul.msk.f32.gmra.mxu1 %vm194_vm1, %v163_v38 }
  0x54   :  { %609 = vmatmul.msk.f32.gmra.mxu3 %vm194_vm1, %v185_v41 }
  0x59   :  { %599 = vmatmul.msk.f32.gmra.mxu2 %vm194_vm1, %v175_v45 }
  0x5a   :  { %577 = vmatmul.msk.f32.gmra.mxu0 %vm194_vm1, %v153_v46  ;;  %588 = vmatmul.msk.f32.gmra.mxu1 %vm194_vm1, %v164_v47 }
  0x87   :  { %v345_v49 = vpop.f32.mrf.mxu0  ;;  %v378_v50 = vpop.f32.mrf.mxu1 }
  0x88   :  { %v346_v51 = vadd.f32 %v830_v48, %v345_v49  ;;  %v379_v52 = vadd.f32 %v830_v48, %v378_v50 }
  0x8a   :  { %v474_v53 = vmax.f32 %v346_v51, 0.0  ;;  %v485_v54 = vmax.f32 %v379_v52, 0.0 }
  0x8c   :  { %518 = vst.msk [vmem:[%s1049_s3] sm:$0xff] %vm517_vm2, %v474_v53  ;;  %v411_v55 = vpop.f32.mrf.mxu2 }
  0x8d   :  { %529 = vst.msk [vmem:[%s1049_s3 + $0x58] sm:$0xff] %vm517_vm2, %v485_v54  ;;  %v412_v56 = vadd.f32 %v830_v48, %v411_v55 }
  0x8f   :  { %v496_v57 = vmax.f32 %v412_v56, 0.0  ;;  %v348_v58 = vpop.f32.mrf.mxu0  ;;  %v381_v59 = vpop.f32.mrf.mxu1 }
  0x90   :  { %v349_v60 = vadd.f32 %v830_v48, %v348_v58  ;;  %v382_v61 = vadd.f32 %v830_v48, %v381_v59  ;;  %v444_v62 = vpop.f32.mrf.mxu3 }
  0x91   :  { %540 = vst.msk [vmem:[%s1049_s3 + $0xb0] sm:$0xff] %vm517_vm2, %v496_v57  ;;  %v445_v63 = vadd.f32 %v830_v48, %v444_v62 }
  0x92   :  { %v475_v0 = vmax.f32 %v349_v60, 0.0  ;;  %v486_v1 = vmax.f32 %v382_v61, 0.0 }
  0x93   :  { %v507_v2 = vmax.f32 %v445_v63, 0.0 }
  0x94   :  { %519 = vst.msk [vmem:[%s1049_s3 + $0x8] sm:$0xff] %vm517_vm2, %v475_v0  ;;  %v414_v3 = vpop.f32.mrf.mxu2 }
  0x95   :  { %530 = vst.msk [vmem:[%s1049_s3 + $0x60] sm:$0xff] %vm517_vm2, %v486_v1  ;;  %v415_v4 = vadd.f32 %v830_v48, %v414_v3 }
  0x96   :  { %551 = vst.msk [vmem:[%s1049_s3 + $0x108] sm:$0xff] %vm517_vm2, %v507_v2 }
  0x97   :  { %v497_v5 = vmax.f32 %v415_v4, 0.0  ;;  %v351_v6 = vpop.f32.mrf.mxu0  ;;  %v384_v7 = vpop.f32.mrf.mxu1 }
  0x98   :  { %v352_v8 = vadd.f32 %v830_v48, %v351_v6  ;;  %v385_v9 = vadd.f32 %v830_v48, %v384_v7  ;;  %v447_v10 = vpop.f32.mrf.mxu3 }
  0x99   :  { %541 = vst.msk [vmem:[%s1049_s3 + $0xb8] sm:$0xff] %vm517_vm2, %v497_v5  ;;  %v448_v11 = vadd.f32 %v830_v48, %v447_v10 }
  0x9a   :  { %v476_v12 = vmax.f32 %v352_v8, 0.0  ;;  %v487_v13 = vmax.f32 %v385_v9, 0.0 }
  0x9b   :  { %v508_v14 = vmax.f32 %v448_v11, 0.0 }
  0x9c   :  { %520 = vst.msk [vmem:[%s1049_s3 + $0x10] sm:$0xff] %vm517_vm2, %v476_v12  ;;  %v417_v15 = vpop.f32.mrf.mxu2 }
  0x9d   :  { %531 = vst.msk [vmem:[%s1049_s3 + $0x68] sm:$0xff] %vm517_vm2, %v487_v13  ;;  %v418_v16 = vadd.f32 %v830_v48, %v417_v15 }
  0x9e   :  { %552 = vst.msk [vmem:[%s1049_s3 + $0x110] sm:$0xff] %vm517_vm2, %v508_v14 }
  0x9f   :  { %v498_v17 = vmax.f32 %v418_v16, 0.0  ;;  %v354_v18 = vpop.f32.mrf.mxu0  ;;  %v387_v19 = vpop.f32.mrf.mxu1 }
  0xa0   :  { %v355_v20 = vadd.f32 %v830_v48, %v354_v18  ;;  %v388_v21 = vadd.f32 %v830_v48, %v387_v19  ;;  %v450_v22 = vpop.f32.mrf.mxu3 }
  0xa1   :  { %542 = vst.msk [vmem:[%s1049_s3 + $0xc0] sm:$0xff] %vm517_vm2, %v498_v17  ;;  %v451_v23 = vadd.f32 %v830_v48, %v450_v22 }
  0xa2   :  { %v477_v24 = vmax.f32 %v355_v20, 0.0  ;;  %v488_v25 = vmax.f32 %v388_v21, 0.0 }
  0xa3   :  { %v509_v26 = vmax.f32 %v451_v23, 0.0 }
  0xa4   :  { %521 = vst.msk [vmem:[%s1049_s3 + $0x18] sm:$0xff] %vm517_vm2, %v477_v24  ;;  %v420_v27 = vpop.f32.mrf.mxu2 }
  0xa5   :  { %532 = vst.msk [vmem:[%s1049_s3 + $0x70] sm:$0xff] %vm517_vm2, %v488_v25  ;;  %v421_v28 = vadd.f32 %v830_v48, %v420_v27 }
  0xa6   :  { %553 = vst.msk [vmem:[%s1049_s3 + $0x118] sm:$0xff] %vm517_vm2, %v509_v26 }
  0xa7   :  { %v499_v29 = vmax.f32 %v421_v28, 0.0  ;;  %v357_v30 = vpop.f32.mrf.mxu0  ;;  %v390_v31 = vpop.f32.mrf.mxu1 }
  0xa8   :  { %v358_v32 = vadd.f32 %v830_v48, %v357_v30  ;;  %v391_v33 = vadd.f32 %v830_v48, %v390_v31  ;;  %v453_v34 = vpop.f32.mrf.mxu3 }
  0xa9   :  { %543 = vst.msk [vmem:[%s1049_s3 + $0xc8] sm:$0xff] %vm517_vm2, %v499_v29  ;;  %v454_v35 = vadd.f32 %v830_v48, %v453_v34 }
  0xaa   :  { %v478_v36 = vmax.f32 %v358_v32, 0.0  ;;  %v489_v37 = vmax.f32 %v391_v33, 0.0 }
  0xab   :  { %v510_v38 = vmax.f32 %v454_v35, 0.0 }
  0xac   :  { %522 = vst.msk [vmem:[%s1049_s3 + $0x20] sm:$0xff] %vm517_vm2, %v478_v36  ;;  %v423_v39 = vpop.f32.mrf.mxu2 }
  0xad   :  { %533 = vst.msk [vmem:[%s1049_s3 + $0x78] sm:$0xff] %vm517_vm2, %v489_v37  ;;  %v424_v40 = vadd.f32 %v830_v48, %v423_v39 }
  0xae   :  { %554 = vst.msk [vmem:[%s1049_s3 + $0x120] sm:$0xff] %vm517_vm2, %v510_v38 }
  0xaf   :  { %v500_v41 = vmax.f32 %v424_v40, 0.0  ;;  %v360_v42 = vpop.f32.mrf.mxu0  ;;  %v393_v43 = vpop.f32.mrf.mxu1 }
  0xb0   :  { %v361_v44 = vadd.f32 %v830_v48, %v360_v42  ;;  %v394_v45 = vadd.f32 %v830_v48, %v393_v43  ;;  %v456_v46 = vpop.f32.mrf.mxu3 }
  0xb1   :  { %544 = vst.msk [vmem:[%s1049_s3 + $0xd0] sm:$0xff] %vm517_vm2, %v500_v41  ;;  %v457_v47 = vadd.f32 %v830_v48, %v456_v46 }
  0xb2   :  { %v479_v49 = vmax.f32 %v361_v44, 0.0  ;;  %v490_v50 = vmax.f32 %v394_v45, 0.0 }
  0xb3   :  { %v511_v51 = vmax.f32 %v457_v47, 0.0 }
  0xb4   :  { %523 = vst.msk [vmem:[%s1049_s3 + $0x28] sm:$0xff] %vm517_vm2, %v479_v49  ;;  %v426_v52 = vpop.f32.mrf.mxu2 }
  0xb5   :  { %534 = vst.msk [vmem:[%s1049_s3 + $0x80] sm:$0xff] %vm517_vm2, %v490_v50  ;;  %v427_v53 = vadd.f32 %v830_v48, %v426_v52 }
  0xb6   :  { %555 = vst.msk [vmem:[%s1049_s3 + $0x128] sm:$0xff] %vm517_vm2, %v511_v51 }
  0xb7   :  { %v501_v54 = vmax.f32 %v427_v53, 0.0  ;;  %v363_v55 = vpop.f32.mrf.mxu0  ;;  %v396_v56 = vpop.f32.mrf.mxu1 }
  0xb8   :  { %v364_v57 = vadd.f32 %v830_v48, %v363_v55  ;;  %v397_v58 = vadd.f32 %v830_v48, %v396_v56  ;;  %v459_v59 = vpop.f32.mrf.mxu3 }
  0xb9   :  { %545 = vst.msk [vmem:[%s1049_s3 + $0xd8] sm:$0xff] %vm517_vm2, %v501_v54  ;;  %v460_v60 = vadd.f32 %v830_v48, %v459_v59 }
  0xba   :  { %v480_v61 = vmax.f32 %v364_v57, 0.0  ;;  %v491_v62 = vmax.f32 %v397_v58, 0.0 }
  0xbb   :  { %v512_v63 = vmax.f32 %v460_v60, 0.0 }
  0xbc   :  { %524 = vst.msk [vmem:[%s1049_s3 + $0x30] sm:$0xff] %vm517_vm2, %v480_v61  ;;  %v429_v0 = vpop.f32.mrf.mxu2 }
  0xbd   :  { %535 = vst.msk [vmem:[%s1049_s3 + $0x88] sm:$0xff] %vm517_vm2, %v491_v62  ;;  %v430_v1 = vadd.f32 %v830_v48, %v429_v0 }
  0xbe   :  { %556 = vst.msk [vmem:[%s1049_s3 + $0x130] sm:$0xff] %vm517_vm2, %v512_v63 }
  0xbf   :  { %v502_v2 = vmax.f32 %v430_v1, 0.0  ;;  %v366_v3 = vpop.f32.mrf.mxu0  ;;  %v399_v4 = vpop.f32.mrf.mxu1 }
  0xc0   :  { %v367_v5 = vadd.f32 %v830_v48, %v366_v3  ;;  %v400_v6 = vadd.f32 %v830_v48, %v399_v4  ;;  %v462_v7 = vpop.f32.mrf.mxu3 }
  0xc1   :  { %546 = vst.msk [vmem:[%s1049_s3 + $0xe0] sm:$0xff] %vm517_vm2, %v502_v2  ;;  %v463_v8 = vadd.f32 %v830_v48, %v462_v7 }
  0xc2   :  { %v481_v9 = vmax.f32 %v367_v5, 0.0  ;;  %v492_v10 = vmax.f32 %v400_v6, 0.0 }
  0xc3   :  { %v513_v11 = vmax.f32 %v463_v8, 0.0 }
  0xc4   :  { %525 = vst.msk [vmem:[%s1049_s3 + $0x38] sm:$0xff] %vm517_vm2, %v481_v9  ;;  %v432_v12 = vpop.f32.mrf.mxu2 }
  0xc5   :  { %536 = vst.msk [vmem:[%s1049_s3 + $0x90] sm:$0xff] %vm517_vm2, %v492_v10  ;;  %v433_v13 = vadd.f32 %v830_v48, %v432_v12 }
  0xc6   :  { %557 = vst.msk [vmem:[%s1049_s3 + $0x138] sm:$0xff] %vm517_vm2, %v513_v11 }
  0xc7   :  { %v503_v14 = vmax.f32 %v433_v13, 0.0  ;;  %v369_v15 = vpop.f32.mrf.mxu0  ;;  %v402_v16 = vpop.f32.mrf.mxu1 }
  0xc8   :  { %v370_v17 = vadd.f32 %v830_v48, %v369_v15  ;;  %v403_v18 = vadd.f32 %v830_v48, %v402_v16  ;;  %v465_v19 = vpop.f32.mrf.mxu3 }
  0xc9   :  { %547 = vst.msk [vmem:[%s1049_s3 + $0xe8] sm:$0xff] %vm517_vm2, %v503_v14  ;;  %v466_v20 = vadd.f32 %v830_v48, %v465_v19 }
  0xca   :  { %v482_v21 = vmax.f32 %v370_v17, 0.0  ;;  %v493_v22 = vmax.f32 %v403_v18, 0.0 }
  0xcb   :  { %v514_v23 = vmax.f32 %v466_v20, 0.0 }
  0xcc   :  { %526 = vst.msk [vmem:[%s1049_s3 + $0x40] sm:$0xff] %vm517_vm2, %v482_v21  ;;  %v435_v24 = vpop.f32.mrf.mxu2 }
  0xcd   :  { %537 = vst.msk [vmem:[%s1049_s3 + $0x98] sm:$0xff] %vm517_vm2, %v493_v22  ;;  %v436_v25 = vadd.f32 %v830_v48, %v435_v24 }
  0xce   :  { %558 = vst.msk [vmem:[%s1049_s3 + $0x140] sm:$0xff] %vm517_vm2, %v514_v23 }
  0xcf   :  { %v504_v26 = vmax.f32 %v436_v25, 0.0  ;;  %v372_v27 = vpop.f32.mrf.mxu0  ;;  %v405_v28 = vpop.f32.mrf.mxu1 }
  0xd0   :  { %v373_v29 = vadd.f32 %v830_v48, %v372_v27  ;;  %v406_v30 = vadd.f32 %v830_v48, %v405_v28  ;;  %v468_v31 = vpop.f32.mrf.mxu3 }
  0xd1   :  { %548 = vst.msk [vmem:[%s1049_s3 + $0xf0] sm:$0xff] %vm517_vm2, %v504_v26  ;;  %v469_v32 = vadd.f32 %v830_v48, %v468_v31 }
  0xd2   :  { %v483_v33 = vmax.f32 %v373_v29, 0.0  ;;  %v494_v34 = vmax.f32 %v406_v30, 0.0 }
  0xd3   :  { %v515_v35 = vmax.f32 %v469_v32, 0.0 }
  0xd4   :  { %527 = vst.msk [vmem:[%s1049_s3 + $0x48] sm:$0xff] %vm517_vm2, %v483_v33  ;;  %v438_v36 = vpop.f32.mrf.mxu2 }
  0xd5   :  { %538 = vst.msk [vmem:[%s1049_s3 + $0xa0] sm:$0xff] %vm517_vm2, %v494_v34  ;;  %v439_v37 = vadd.f32 %v830_v48, %v438_v36 }
  0xd6   :  { %559 = vst.msk [vmem:[%s1049_s3 + $0x148] sm:$0xff] %vm517_vm2, %v515_v35 }
  0xd7   :  { %v505_v38 = vmax.f32 %v439_v37, 0.0  ;;  %v375_v39 = vpop.f32.mrf.mxu0  ;;  %v408_v40 = vpop.f32.mrf.mxu1 }
  0xd8   :  { %v376_v41 = vadd.f32 %v830_v48, %v375_v39  ;;  %v409_v42 = vadd.f32 %v830_v48, %v408_v40  ;;  %v471_v43 = vpop.f32.mrf.mxu3 }
  0xd9   :  { %549 = vst.msk [vmem:[%s1049_s3 + $0xf8] sm:$0xff] %vm517_vm2, %v505_v38  ;;  %v472_v44 = vadd.f32 %v830_v48, %v471_v43 }
  0xda   :  { %v484_v45 = vmax.f32 %v376_v41, 0.0  ;;  %v495_v46 = vmax.f32 %v409_v42, 0.0 }
  0xdb   :  { %v516_v47 = vmax.f32 %v472_v44, 0.0 }
  0xdc   :  { %528 = vst.msk [vmem:[%s1049_s3 + $0x50] sm:$0xff] %vm517_vm2, %v484_v45  ;;  %v441_v49 = vpop.f32.mrf.mxu2 }
  0xdd   :  { %539 = vst.msk [vmem:[%s1049_s3 + $0xa8] sm:$0xff] %vm517_vm2, %v495_v46  ;;  %v442_v50 = vadd.f32 %v830_v48, %v441_v49 }
  0xde   :  { %561 = vst.msk [vmem:[%s1049_s3 + $0x150] sm:$0x3] %vm560_vm3, %v516_v47 }
  0xdf   :  { %v506_v51 = vmax.f32 %v442_v50, 0.0 }
  0xe1   :  { %550 = vst.msk [vmem:[%s1049_s3 + $0x100] sm:$0xff] %vm517_vm2, %v506_v51 }

// kernel: forward.4
= control target key start
LH: loop header
LB: loop body
LE: loop exit
PB: predicated region body
PF: predicated region fallthrough
CT: control target
= control target key end

     0   :  { %vm96_vm0 = vcmask 130048   ;;  %vm277_vm1 = vcmask 261120   ;;  %vm284_vm2 = vcmask 254976   ;;  %s589_s1 = inlined_call_operand.vmem [shape: f32[400,32], index: 1, kind: input, shape index: {}]   ;;  %s590_s0 = inlined_call_operand.vmem [shape: f32[50,400], index: 0, kind: input, shape index: {}]   ;;  %s591_s2 = inlined_call_operand.vmem [shape: f32[1,32], index: 2, kind: input, shape index: {}]   ;;  %s592_s3 = inlined_call_operand.vmem [shape: f32[50,32], index: 3, kind: output, shape index: {}]  }
   0x1   :  { %v89_v0 = vld [vmem:[%s589_s1 + $0x178] sm:$0xff]  ;;  %v88_v2 = vld [vmem:[%s589_s1 + $0x170] sm:$0xff]  ;;  %v87_v5 = vld [vmem:[%s589_s1 + $0x168] sm:$0xff] }
   0x2   :  { %v57_v1 = vld [vmem:[%s589_s1 + $0x78] sm:$0xff]  ;;  %194 = vmatpush.msra.mxu2 %v89_v0  ;;  %v56_v3 = vld [vmem:[%s589_s1 + $0x70] sm:$0xff]  ;;  %v55_v6 = vld [vmem:[%s589_s1 + $0x68] sm:$0xff] }
   0x3   :  { %118 = vmatpush.msra.mxu0 %v57_v1  ;;  %v73_v4 = vld [vmem:[%s589_s1 + $0xf8] sm:$0xff]  ;;  %v72_v7 = vld [vmem:[%s589_s1 + $0xf0] sm:$0xff]  ;;  %v71_v8 = vld [vmem:[%s589_s1 + $0xe8] sm:$0xff] }
   0x4   :  { %156 = vmatpush.msra.mxu1 %v73_v4  ;;  %195 = vmatpush.msra.mxu2 %v88_v2  ;;  %v86_v9 = vld [vmem:[%s589_s1 + $0x160] sm:$0xff]  ;;  %v85_v12 = vld [vmem:[%s589_s1 + $0x158] sm:$0xff]  ;;  %v84_v15 = vld [vmem:[%s589_s1 + $0x150] sm:$0xff] }
   0x5   :  { %119 = vmatpush.msra.mxu0 %v56_v3  ;;  %v54_v10 = vld [vmem:[%s589_s1 + $0x60] sm:$0xff]  ;;  %v53_v13 = vld [vmem:[%s589_s1 + $0x58] sm:$0xff]  ;;  %v52_v16 = vld [vmem:[%s589_s1 + $0x50] sm:$0xff] }
   0x6   :  { %157 = vmatpush.msra.mxu1 %v72_v7  ;;  %196 = vmatpush.msra.mxu2 %v87_v5  ;;  %v70_v11 = vld [vmem:[%s589_s1 + $0xe0] sm:$0xff]  ;;  %v69_v14 = vld [vmem:[%s589_s1 + $0xd8] sm:$0xff]  ;;  %v68_v17 = vld [vmem:[%s589_s1 + $0xd0] sm:$0xff] }
   0x7   :  { %120 = vmatpush.msra.mxu0 %v55_v6  ;;  %v83_v18 = vld [vmem:[%s589_s1 + $0x148] sm:$0xff]  ;;  %v82_v21 = vld [vmem:[%s589_s1 + $0x140] sm:$0xff]  ;;  %v81_v24 = vld [vmem:[%s589_s1 + $0x138] sm:$0xff] }
   0x8   :  { %158 = vmatpush.msra.mxu1 %v71_v8  ;;  %197 = vmatpush.msra.mxu2 %v86_v9  ;;  %v51_v19 = vld [vmem:[%s589_s1 + $0x48] sm:$0xff]  ;;  %v50_v22 = vld [vmem:[%s589_s1 + $0x40] sm:$0xff]  ;;  %v49_v25 = vld [vmem:[%s589_s1 + $0x38] sm:$0xff] }
   0x9   :  { %121 = vmatpush.msra.mxu0 %v54_v10  ;;  %v67_v20 = vld [vmem:[%s589_s1 + $0xc8] sm:$0xff]  ;;  %v66_v23 = vld [vmem:[%s589_s1 + $0xc0] sm:$0xff]  ;;  %v65_v26 = vld [vmem:[%s589_s1 + $0xb8] sm:$0xff] }
   0xa   :  { %159 = vmatpush.msra.mxu1 %v70_v11  ;;  %198 = vmatpush.msra.mxu2 %v85_v12  ;;  %v91_v27 = vld [vmem:[%s589_s1 + $0x188] sm:$0xff]  ;;  %v80_v28 = vld [vmem:[%s589_s1 + $0x130] sm:$0xff]  ;;  %v90_v30 = vld [vmem:[%s589_s1 + $0x180] sm:$0xff] }
   0xb   :  { %122 = vmatpush.msra.mxu0 %v53_v13  ;;  %v48_v29 = vld [vmem:[%s589_s1 + $0x30] sm:$0xff]  ;;  %246 = vmatpush.msra.mxu3 %v91_v27  ;;  %v17_v32 = vld [vmem:[%s590_s0 + $0x18] sm:$0xff]  ;;  %v79_v33 = vld [vmem:[%s589_s1 + $0x128] sm:$0xff] }
   0xc   :  { %160 = vmatpush.msra.mxu1 %v69_v14  ;;  %199 = vmatpush.msra.mxu2 %v84_v15  ;;  %v64_v31 = vld [vmem:[%s589_s1 + $0xb0] sm:$0xff]  ;;  %v47_v34 = vld [vmem:[%s589_s1 + $0x28] sm:$0xff]  ;;  %v78_v36 = vld [vmem:[%s589_s1 + $0x120] sm:$0xff] }
   0xd   :  { %123 = vmatpush.msra.mxu0 %v52_v16  ;;  %247 = vmatpush.msra.mxu3 %v90_v30  ;;  %v63_v35 = vld [vmem:[%s589_s1 + $0xa8] sm:$0xff]  ;;  %v46_v37 = vld [vmem:[%s589_s1 + $0x20] sm:$0xff]  ;;  %v77_v39 = vld [vmem:[%s589_s1 + $0x118] sm:$0xff] }
   0xe   :  { %161 = vmatpush.msra.mxu1 %v68_v17  ;;  %200 = vmatpush.msra.mxu2 %v83_v18  ;;  %v62_v38 = vld [vmem:[%s589_s1 + $0xa0] sm:$0xff]  ;;  %v45_v40 = vld [vmem:[%s589_s1 + $0x18] sm:$0xff]  ;;  %v76_v42 = vld [vmem:[%s589_s1 + $0x110] sm:$0xff] }
   0xf   :  { %124 = vmatpush.msra.mxu0 %v51_v19  ;;  %290 = vmatmul.msk.f32.vlgmr.msra.gmra.mxu3 %vm96_vm0, %v17_v32  ;;  %v61_v41 = vld [vmem:[%s589_s1 + $0x98] sm:$0xff]  ;;  %v44_v43 = vld [vmem:[%s589_s1 + $0x10] sm:$0xff]  ;;  %v75_v46 = vld [vmem:[%s589_s1 + $0x108] sm:$0xff] }
  0x10   :  { %162 = vmatpush.msra.mxu1 %v67_v20  ;;  %201 = vmatpush.msra.mxu2 %v82_v21  ;;  %v60_v44 = vld [vmem:[%s589_s1 + $0x90] sm:$0xff]  ;;  %v21_v45 = vld [vmem:[%s590_s0 + $0x38] sm:$0xff]  ;;  %v43_v47 = vld [vmem:[%s589_s1 + $0x8] sm:$0xff] }
  0x11   :  { %125 = vmatpush.msra.mxu0 %v50_v22  ;;  %v59_v48 = vld [vmem:[%s589_s1 + $0x88] sm:$0xff]  ;;  %v74_v49 = vld [vmem:[%s589_s1 + $0x100] sm:$0xff]  ;;  %v16_v51 = vld [vmem:[%s590_s0 + $0x10] sm:$0xff] }
  0x12   :  { %163 = vmatpush.msra.mxu1 %v66_v23  ;;  %202 = vmatpush.msra.mxu2 %v81_v24  ;;  %v42_v50 = vld [vmem:[%s589_s1] sm:$0xff]  ;;  %v15_v54 = vld [vmem:[%s590_s0 + $0x8] sm:$0xff]  ;;  %v25_v55 = vld [vmem:[%s590_s0 + $0x58] sm:$0xff] }
  0x13   :  { %126 = vmatpush.msra.mxu0 %v49_v25  ;;  %v14_v52 = vld [vmem:[%s590_s0] sm:$0xff]  ;;  %v20_v56 = vld [vmem:[%s590_s0 + $0x30] sm:$0xff]  ;;  %v19_v58 = vld [vmem:[%s590_s0 + $0x28] sm:$0xff] }
  0x14   :  { %164 = vmatpush.msra.mxu1 %v65_v26  ;;  %203 = vmatpush.msra.mxu2 %v80_v28  ;;  %v58_v53 = vld [vmem:[%s589_s1 + $0x80] sm:$0xff]  ;;  %v29_v59 = vld [vmem:[%s590_s0 + $0x78] sm:$0xff]  ;;  %v24_v60 = vld [vmem:[%s590_s0 + $0x50] sm:$0xff] }
  0x15   :  { %127 = vmatpush.msra.mxu0 %v48_v29  ;;  %v18_v57 = vld [vmem:[%s590_s0 + $0x20] sm:$0xff]  ;;  %v23_v62 = vld [vmem:[%s590_s0 + $0x48] sm:$0xff]  ;;  %v33_v63 = vld [vmem:[%s590_s0 + $0x98] sm:$0xff] }
  0x16   :  { %165 = vmatpush.msra.mxu1 %v64_v31  ;;  %204 = vmatpush.msra.mxu2 %v79_v33  ;;  %v22_v61 = vld [vmem:[%s590_s0 + $0x40] sm:$0xff]  ;;  %v28_v0 = vld [vmem:[%s590_s0 + $0x70] sm:$0xff]  ;;  %v27_v2 = vld [vmem:[%s590_s0 + $0x68] sm:$0xff] }
  0x17   :  { %128 = vmatpush.msra.mxu0 %v47_v34  ;;  %291 = vmatmul.msk.f32.gmra.mxu3 %vm96_vm0, %v21_v45  ;;  %v26_v1 = vld [vmem:[%s590_s0 + $0x60] sm:$0xff]  ;;  %v37_v3 = vld [vmem:[%s590_s0 + $0xb8] sm:$0xff]  ;;  %v32_v4 = vld [vmem:[%s590_s0 + $0x90] sm:$0xff] }
  0x18   :  { %166 = vmatpush.msra.mxu1 %v63_v35  ;;  %205 = vmatpush.msra.mxu2 %v78_v36  ;;  %v30_v5 = vld [vmem:[%s590_s0 + $0x80] sm:$0xff]  ;;  %v31_v6 = vld [vmem:[%s590_s0 + $0x88] sm:$0xff]  ;;  %v41_v7 = vld [vmem:[%s590_s0 + $0xd8] sm:$0x3] }
  0x19   :  { %129 = vmatpush.msra.mxu0 %v46_v37  ;;  %v36_v8 = vld [vmem:[%s590_s0 + $0xb0] sm:$0xff]  ;;  %v34_v9 = vld [vmem:[%s590_s0 + $0xa0] sm:$0xff]  ;;  %v35_v10 = vld [vmem:[%s590_s0 + $0xa8] sm:$0xff] }
  0x1a   :  { %167 = vmatpush.msra.mxu1 %v62_v38  ;;  %206 = vmatpush.msra.mxu2 %v77_v39  ;;  %v40_v11 = vld [vmem:[%s590_s0 + $0xd0] sm:$0x3]  ;;  %v38_v12 = vld [vmem:[%s590_s0 + $0xc0] sm:$0x3]  ;;  %v39_v13 = vld [vmem:[%s590_s0 + $0xc8] sm:$0x3] }
  0x1b   :  { %130 = vmatpush.msra.mxu0 %v45_v40  ;;  %v297_v15 = vld [vmem:[%s591_s2] ss:$0 sm:$0xff] }
  0x1c   :  { %168 = vmatpush.msra.mxu1 %v61_v41  ;;  %207 = vmatpush.msra.mxu2 %v76_v42 }
  0x1d   :  { %131 = vmatpush.msra.mxu0 %v44_v43 }
  0x1e   :  { %169 = vmatpush.msra.mxu1 %v60_v44  ;;  %208 = vmatpush.msra.mxu2 %v75_v46 }
  0x1f   :  { %132 = vmatpush.msra.mxu0 %v43_v47  ;;  %292 = vmatmul.msk.f32.gmra.mxu3 %vm96_vm0, %v25_v55 }
  0x20   :  { %170 = vmatpush.msra.mxu1 %v59_v48  ;;  %209 = vmatpush.msra.mxu2 %v74_v49 }
  0x21   :  { %133 = vmatpush.msra.mxu0 %v42_v50  ;;  %210 = vmatmul.f32.vlgmr.msra.gmra.mxu2 %v16_v51 }
  0x22   :  { %134 = vmatmul.f32.vlgmr.msra.gmra.mxu0 %v14_v52  ;;  %171 = vmatpush.msra.mxu1 %v58_v53 }
  0x23   :  { %172 = vmatmul.f32.vlgmr.msra.gmra.mxu1 %v15_v54 }
  0x27   :  { %293 = vmatmul.msk.f32.gmra.mxu3 %vm96_vm0, %v29_v59 }
  0x29   :  { %213 = vmatmul.f32.gmra.mxu2 %v20_v56 }
  0x2a   :  { %137 = vmatmul.f32.gmra.mxu0 %v18_v57 }
  0x2b   :  { %175 = vmatmul.f32.gmra.mxu1 %v19_v58 }
  0x2f   :  { %294 = vmatmul.msk.f32.gmra.mxu3 %vm96_vm0, %v33_v63 }
  0x31   :  { %216 = vmatmul.f32.gmra.mxu2 %v24_v60 }
  0x32   :  { %140 = vmatmul.f32.gmra.mxu0 %v22_v61 }
  0x33   :  { %178 = vmatmul.f32.gmra.mxu1 %v23_v62 }
  0x37   :  { %295 = vmatmul.msk.f32.gmra.mxu3 %vm96_vm0, %v37_v3 }
  0x39   :  { %219 = vmatmul.f32.gmra.mxu2 %v28_v0 }
  0x3a   :  { %143 = vmatmul.f32.gmra.mxu0 %v26_v1 }
  0x3b   :  { %181 = vmatmul.f32.gmra.mxu1 %v27_v2 }
  0x3f   :  { %296 = vmatmul.msk.f32.gmra.mxu3 %vm96_vm0, %v41_v7 }
  0x41   :  { %222 = vmatmul.f32.gmra.mxu2 %v32_v4 }
  0x42   :  { %146 = vmatmul.f32.gmra.mxu0 %v30_v5 }
  0x43   :  { %184 = vmatmul.f32.gmra.mxu1 %v31_v6 }
  0x49   :  { %225 = vmatmul.f32.gmra.mxu2 %v36_v8 }
  0x4a   :  { %149 = vmatmul.f32.gmra.mxu0 %v34_v9 }
  0x4b   :  { %187 = vmatmul.f32.gmra.mxu1 %v35_v10 }
  0x51   :  { %228 = vmatmul.f32.gmra.mxu2 %v40_v11 }
  0x52   :  { %152 = vmatmul.f32.gmra.mxu0 %v38_v12 }
  0x53   :  { %190 = vmatmul.f32.gmra.mxu1 %v39_v13 }
  0x92   :  { %v249_v14 = vpop.f32.mrf.mxu3 }
  0x9a   :  { %v252_v20 = vpop.f32.mrf.mxu3 }
  0x9f   :  { %v135_v16 = vpop.f32.mrf.mxu0 }
  0xa0   :  { %v136_v17 = vadd.f32 %v297_v15, %v135_v16  ;;  %v173_v18 = vpop.f32.mrf.mxu1 }
  0xa2   :  { %v174_v19 = vadd.f32 %v173_v18, %v136_v17  ;;  %v255_v30 = vpop.f32.mrf.mxu3 }
  0xa4   :  { %v211_v21 = vpop.f32.mrf.mxu2 }
  0xa5   :  { %v212_v22 = vadd.f32 %v211_v21, %v174_v19 }
  0xa7   :  { %v138_v23 = vpop.f32.mrf.mxu0  ;;  %v250_v24 = vadd.f32 %v249_v14, %v212_v22 }
  0xa8   :  { %v139_v25 = vadd.f32 %v297_v15, %v138_v23  ;;  %v176_v26 = vpop.f32.mrf.mxu1 }
  0xa9   :  { %v270_v27 = vmax.f32 %v250_v24, 0.0 }
  0xaa   :  { %v177_v28 = vadd.f32 %v176_v26, %v139_v25  ;;  %v258_v41 = vpop.f32.mrf.mxu3 }
  0xab   :  { %278 = vst.msk [vmem:[%s592_s3] sm:$0xff] %vm277_vm1, %v270_v27 }
  0xac   :  { %v214_v29 = vpop.f32.mrf.mxu2 }
  0xad   :  { %v215_v31 = vadd.f32 %v214_v29, %v177_v28 }
  0xaf   :  { %v141_v32 = vpop.f32.mrf.mxu0  ;;  %v253_v33 = vadd.f32 %v252_v20, %v215_v31 }
  0xb0   :  { %v142_v34 = vadd.f32 %v297_v15, %v141_v32  ;;  %v179_v35 = vpop.f32.mrf.mxu1 }
  0xb1   :  { %v271_v36 = vmax.f32 %v253_v33, 0.0 }
  0xb2   :  { %v180_v37 = vadd.f32 %v179_v35, %v142_v34  ;;  %v261_v53 = vpop.f32.mrf.mxu3 }
  0xb3   :  { %279 = vst.msk [vmem:[%s592_s3 + $0x8] sm:$0xff] %vm277_vm1, %v271_v36 }
  0xb4   :  { %v217_v38 = vpop.f32.mrf.mxu2 }
  0xb5   :  { %v218_v39 = vadd.f32 %v217_v38, %v180_v37 }
  0xb7   :  { %v144_v40 = vpop.f32.mrf.mxu0  ;;  %v256_v42 = vadd.f32 %v255_v30, %v218_v39 }
  0xb8   :  { %v145_v43 = vadd.f32 %v297_v15, %v144_v40  ;;  %v182_v44 = vpop.f32.mrf.mxu1 }
  0xb9   :  { %v272_v45 = vmax.f32 %v256_v42, 0.0 }
  0xba   :  { %v183_v46 = vadd.f32 %v182_v44, %v145_v43  ;;  %v264_v0 = vpop.f32.mrf.mxu3 }
  0xbb   :  { %280 = vst.msk [vmem:[%s592_s3 + $0x10] sm:$0xff] %vm277_vm1, %v272_v45 }
  0xbc   :  { %v220_v47 = vpop.f32.mrf.mxu2 }
  0xbd   :  { %v221_v48 = vadd.f32 %v220_v47, %v183_v46 }
  0xbf   :  { %v147_v49 = vpop.f32.mrf.mxu0  ;;  %v259_v50 = vadd.f32 %v258_v41, %v221_v48 }
  0xc0   :  { %v148_v51 = vadd.f32 %v297_v15, %v147_v49  ;;  %v185_v52 = vpop.f32.mrf.mxu1 }
  0xc1   :  { %v273_v54 = vmax.f32 %v259_v50, 0.0 }
  0xc2   :  { %v186_v55 = vadd.f32 %v185_v52, %v148_v51  ;;  %v267_v10 = vpop.f32.mrf.mxu3 }
  0xc3   :  { %281 = vst.msk [vmem:[%s592_s3 + $0x18] sm:$0xff] %vm277_vm1, %v273_v54 }
  0xc4   :  { %v223_v56 = vpop.f32.mrf.mxu2 }
  0xc5   :  { %v224_v57 = vadd.f32 %v223_v56, %v186_v55 }
  0xc7   :  { %v150_v58 = vpop.f32.mrf.mxu0  ;;  %v262_v59 = vadd.f32 %v261_v53, %v224_v57 }
  0xc8   :  { %v151_v60 = vadd.f32 %v297_v15, %v150_v58  ;;  %v188_v61 = vpop.f32.mrf.mxu1 }
  0xc9   :  { %v274_v62 = vmax.f32 %v262_v59, 0.0 }
  0xca   :  { %v189_v63 = vadd.f32 %v188_v61, %v151_v60 }
  0xcb   :  { %282 = vst.msk [vmem:[%s592_s3 + $0x20] sm:$0xff] %vm277_vm1, %v274_v62 }
  0xcc   :  { %v226_v1 = vpop.f32.mrf.mxu2 }
  0xcd   :  { %v227_v2 = vadd.f32 %v226_v1, %v189_v63 }
  0xcf   :  { %v153_v3 = vpop.f32.mrf.mxu0  ;;  %v265_v4 = vadd.f32 %v264_v0, %v227_v2 }
  0xd0   :  { %v154_v5 = vadd.f32 %v297_v15, %v153_v3  ;;  %v191_v6 = vpop.f32.mrf.mxu1 }
  0xd1   :  { %v275_v7 = vmax.f32 %v265_v4, 0.0 }
  0xd2   :  { %v192_v8 = vadd.f32 %v191_v6, %v154_v5 }
  0xd3   :  { %283 = vst.msk [vmem:[%s592_s3 + $0x28] sm:$0xff] %vm277_vm1, %v275_v7 }
  0xd4   :  { %v229_v9 = vpop.f32.mrf.mxu2 }
  0xd5   :  { %v230_v11 = vadd.f32 %v229_v9, %v192_v8 }
  0xd7   :  { %v268_v12 = vadd.f32 %v267_v10, %v230_v11 }
  0xd9   :  { %v276_v13 = vmax.f32 %v268_v12, 0.0 }
  0xdb   :  { %285 = vst.msk [vmem:[%s592_s3 + $0x30] sm:$0x3] %vm284_vm2, %v276_v13 }

// kernel: forward.5
= control target key start
LH: loop header
LB: loop body
LE: loop exit
PB: predicated region body
PF: predicated region fallthrough
CT: control target
= control target key end

     0   :  { %s1850_s0 = inlined_call_operand.vmem [shape: f32[2,800], index: 0, kind: input, shape index: {}]   ;;  %s1851_s1 = inlined_call_operand.vmem [shape: f32[800,64], index: 1, kind: input, shape index: {}]   ;;  %s1852_s2 = inlined_call_operand.vmem [shape: f32[1,64], index: 2, kind: input, shape index: {}]   ;;  %s1853_s3 = inlined_call_operand.vmem [shape: f32[64,1024], index: 3, kind: input, shape index: {}]   ;;  %s1854_s4 = inlined_call_operand.vmem [shape: f32[1,1024], index: 4, kind: input, shape index: {}]   ;;  %s1855_s5 = inlined_call_operand.vmem [shape: f32[1024,12], index: 5, kind: input, shape index: {}]   ;;  %s1856_s6 = inlined_call_operand.vmem [shape: f32[1,12], index: 6, kind: input, shape index: {}]   ;;  %s1857_s7 = inlined_call_operand.hbm [shape: f32[2,12], index: 7, kind: output, shape index: {}]  }
   0x1   :  { %v44_v0 = vld [vmem:[%s1851_s1 + $0x78] sm:$0xff]  ;;  %v43_v1 = vld [vmem:[%s1851_s1 + $0x70] sm:$0xff]  ;;  %v42_v4 = vld [vmem:[%s1851_s1 + $0x68] sm:$0xff] }
   0x2   :  { %v60_v2 = vld [vmem:[%s1851_s1 + $0xf8] sm:$0xff]  ;;  %154 = vmatpush.msra.mxu0 %v44_v0  ;;  %v59_v3 = vld [vmem:[%s1851_s1 + $0xf0] sm:$0xff]  ;;  %v58_v5 = vld [vmem:[%s1851_s1 + $0xe8] sm:$0xff] }
   0x3   :  { %174 = vmatpush.msra.mxu1 %v60_v2  ;;  %v41_v6 = vld [vmem:[%s1851_s1 + $0x60] sm:$0xff]  ;;  %v40_v8 = vld [vmem:[%s1851_s1 + $0x58] sm:$0xff]  ;;  %v39_v10 = vld [vmem:[%s1851_s1 + $0x50] sm:$0xff] }
   0x4   :  { %155 = vmatpush.msra.mxu0 %v43_v1  ;;  %v57_v7 = vld [vmem:[%s1851_s1 + $0xe0] sm:$0xff]  ;;  %v56_v9 = vld [vmem:[%s1851_s1 + $0xd8] sm:$0xff]  ;;  %v55_v12 = vld [vmem:[%s1851_s1 + $0xd0] sm:$0xff] }
   0x5   :  { %175 = vmatpush.msra.mxu1 %v59_v3  ;;  %v76_v11 = vld [vmem:[%s1851_s1 + $0x178] sm:$0xff]  ;;  %v75_v13 = vld [vmem:[%s1851_s1 + $0x170] sm:$0xff]  ;;  %v74_v15 = vld [vmem:[%s1851_s1 + $0x168] sm:$0xff] }
   0x6   :  { %156 = vmatpush.msra.mxu0 %v42_v4  ;;  %194 = vmatpush.msra.mxu2 %v76_v11  ;;  %v92_v14 = vld [vmem:[%s1851_s1 + $0x1f8] sm:$0xff]  ;;  %v91_v16 = vld [vmem:[%s1851_s1 + $0x1f0] sm:$0xff]  ;;  %v38_v17 = vld [vmem:[%s1851_s1 + $0x48] sm:$0xff] }
   0x7   :  { %176 = vmatpush.msra.mxu1 %v58_v5  ;;  %v54_v18 = vld [vmem:[%s1851_s1 + $0xc8] sm:$0xff]  ;;  %214 = vmatpush.msra.mxu3 %v92_v14  ;;  %v73_v19 = vld [vmem:[%s1851_s1 + $0x160] sm:$0xff]  ;;  %v72_v23 = vld [vmem:[%s1851_s1 + $0x158] sm:$0xff] }
   0x8   :  { %157 = vmatpush.msra.mxu0 %v41_v6  ;;  %195 = vmatpush.msra.mxu2 %v75_v13  ;;  %v90_v20 = vld [vmem:[%s1851_s1 + $0x1e8] sm:$0xff]  ;;  %v37_v21 = vld [vmem:[%s1851_s1 + $0x40] sm:$0xff]  ;;  %v36_v25 = vld [vmem:[%s1851_s1 + $0x38] sm:$0xff] }
   0x9   :  { %177 = vmatpush.msra.mxu1 %v57_v7  ;;  %v53_v22 = vld [vmem:[%s1851_s1 + $0xc0] sm:$0xff]  ;;  %215 = vmatpush.msra.mxu3 %v91_v16  ;;  %v52_v26 = vld [vmem:[%s1851_s1 + $0xb8] sm:$0xff]  ;;  %v71_v27 = vld [vmem:[%s1851_s1 + $0x150] sm:$0xff] }
   0xa   :  { %158 = vmatpush.msra.mxu0 %v40_v8  ;;  %196 = vmatpush.msra.mxu2 %v74_v15  ;;  %v89_v24 = vld [vmem:[%s1851_s1 + $0x1e0] sm:$0xff]  ;;  %v88_v28 = vld [vmem:[%s1851_s1 + $0x1d8] sm:$0xff]  ;;  %v35_v29 = vld [vmem:[%s1851_s1 + $0x30] sm:$0xff] }
   0xb   :  { %178 = vmatpush.msra.mxu1 %v56_v9  ;;  %216 = vmatpush.msra.mxu3 %v90_v20  ;;  %v51_v30 = vld [vmem:[%s1851_s1 + $0xb0] sm:$0xff]  ;;  %v70_v31 = vld [vmem:[%s1851_s1 + $0x148] sm:$0xff]  ;;  %v69_v35 = vld [vmem:[%s1851_s1 + $0x140] sm:$0xff] }
   0xc   :  { %159 = vmatpush.msra.mxu0 %v39_v10  ;;  %197 = vmatpush.msra.mxu2 %v73_v19  ;;  %v87_v32 = vld [vmem:[%s1851_s1 + $0x1d0] sm:$0xff]  ;;  %v34_v33 = vld [vmem:[%s1851_s1 + $0x28] sm:$0xff]  ;;  %v33_v37 = vld [vmem:[%s1851_s1 + $0x20] sm:$0xff] }
   0xd   :  { %179 = vmatpush.msra.mxu1 %v55_v12  ;;  %217 = vmatpush.msra.mxu3 %v89_v24  ;;  %v50_v34 = vld [vmem:[%s1851_s1 + $0xa8] sm:$0xff]  ;;  %v49_v38 = vld [vmem:[%s1851_s1 + $0xa0] sm:$0xff]  ;;  %v68_v39 = vld [vmem:[%s1851_s1 + $0x138] sm:$0xff] }
   0xe   :  { %160 = vmatpush.msra.mxu0 %v38_v17  ;;  %198 = vmatpush.msra.mxu2 %v72_v23  ;;  %v86_v36 = vld [vmem:[%s1851_s1 + $0x1c8] sm:$0xff]  ;;  %v85_v40 = vld [vmem:[%s1851_s1 + $0x1c0] sm:$0xff]  ;;  %v32_v41 = vld [vmem:[%s1851_s1 + $0x18] sm:$0xff] }
   0xf   :  { %180 = vmatpush.msra.mxu1 %v54_v18  ;;  %218 = vmatpush.msra.mxu3 %v88_v28  ;;  %v48_v42 = vld [vmem:[%s1851_s1 + $0x98] sm:$0xff]  ;;  %v67_v43 = vld [vmem:[%s1851_s1 + $0x130] sm:$0xff]  ;;  %v66_v47 = vld [vmem:[%s1851_s1 + $0x128] sm:$0xff] }
  0x10   :  { %161 = vmatpush.msra.mxu0 %v37_v21  ;;  %199 = vmatpush.msra.mxu2 %v71_v27  ;;  %v84_v44 = vld [vmem:[%s1851_s1 + $0x1b8] sm:$0xff]  ;;  %v31_v45 = vld [vmem:[%s1851_s1 + $0x10] sm:$0xff]  ;;  %v30_v49 = vld [vmem:[%s1851_s1 + $0x8] sm:$0xff] }
  0x11   :  { %181 = vmatpush.msra.mxu1 %v53_v22  ;;  %219 = vmatpush.msra.mxu3 %v87_v32  ;;  %v47_v46 = vld [vmem:[%s1851_s1 + $0x90] sm:$0xff]  ;;  %v46_v50 = vld [vmem:[%s1851_s1 + $0x88] sm:$0xff]  ;;  %v65_v51 = vld [vmem:[%s1851_s1 + $0x120] sm:$0xff] }
  0x12   :  { %162 = vmatpush.msra.mxu0 %v36_v25  ;;  %200 = vmatpush.msra.mxu2 %v70_v31  ;;  %v83_v48 = vld [vmem:[%s1851_s1 + $0x1b0] sm:$0xff]  ;;  %v82_v52 = vld [vmem:[%s1851_s1 + $0x1a8] sm:$0xff]  ;;  %v29_v53 = vld [vmem:[%s1851_s1] sm:$0xff] }
  0x13   :  { %182 = vmatpush.msra.mxu1 %v52_v26  ;;  %220 = vmatpush.msra.mxu3 %v86_v36  ;;  %v45_v54 = vld [vmem:[%s1851_s1 + $0x80] sm:$0xff]  ;;  %v108_v56 = vld [vmem:[%s1851_s1 + $0x278] sm:$0xff]  ;;  %v107_v60 = vld [vmem:[%s1851_s1 + $0x270] sm:$0xff] }
  0x14   :  { %163 = vmatpush.msra.mxu0 %v35_v29  ;;  %201 = vmatpush.msra.mxu2 %v69_v35  ;;  %v27_v55 = vld [vmem:[%s1850_s0] sm:$0xff]  ;;  %v124_v57 = vld [vmem:[%s1851_s1 + $0x2f8] sm:$0xff]  ;;  %v123_v61 = vld [vmem:[%s1851_s1 + $0x2f0] sm:$0xff] }
  0x15   :  { %183 = vmatpush.msra.mxu1 %v51_v30  ;;  %221 = vmatpush.msra.mxu3 %v85_v40  ;;  %135 = vst [vmem:[#allocation1] ss:$4 sm:$0xff] %v27_v55  ;;  %v64_v58 = vld [vmem:[%s1851_s1 + $0x118] sm:$0xff]  ;;  %v81_v59 = vld [vmem:[%s1851_s1 + $0x1a0] sm:$0xff]  ;;  %v63_v62 = vld [vmem:[%s1851_s1 + $0x110] sm:$0xff] }
  0x16   :  { %164 = vmatpush.msra.mxu0 %v34_v33  ;;  %202 = vmatpush.msra.mxu2 %v68_v39  ;;  %v80_v63 = vld [vmem:[%s1851_s1 + $0x198] sm:$0xff]  ;;  %v28_v0 = vld [vmem:[%s1850_s0 + $0x8] sm:$0x3f]  ;;  %v79_v4 = vld [vmem:[%s1851_s1 + $0x190] sm:$0xff] }
  0x17   :  { %184 = vmatpush.msra.mxu1 %v50_v34  ;;  %222 = vmatpush.msra.mxu3 %v84_v44  ;;  %v106_v1 = vld [vmem:[%s1851_s1 + $0x268] sm:$0xff]  ;;  %137 = vst [vmem:[#allocation1 + $0x20] ss:$4 sm:$0xff] %v28_v0  ;;  %v105_v5 = vld [vmem:[%s1851_s1 + $0x260] sm:$0xff]  ;;  %v104_v9 = vld [vmem:[%s1851_s1 + $0x258] sm:$0xff] }
  0x18   :  { %165 = vmatpush.msra.mxu0 %v33_v37  ;;  %203 = vmatpush.msra.mxu2 %v67_v43  ;;  %v122_v2 = vld [vmem:[%s1851_s1 + $0x2e8] sm:$0xff]  ;;  %v121_v6 = vld [vmem:[%s1851_s1 + $0x2e0] sm:$0xff]  ;;  %v120_v10 = vld [vmem:[%s1851_s1 + $0x2d8] sm:$0xff] }
  0x19   :  { %185 = vmatpush.msra.mxu1 %v49_v38  ;;  %223 = vmatpush.msra.mxu3 %v83_v48  ;;  %v62_v3 = vld [vmem:[%s1851_s1 + $0x108] sm:$0xff]  ;;  %v61_v7 = vld [vmem:[%s1851_s1 + $0x100] sm:$0xff]  ;;  %v103_v13 = vld [vmem:[%s1851_s1 + $0x250] sm:$0xff] }
  0x1a   :  { %166 = vmatpush.msra.mxu0 %v32_v41  ;;  %204 = vmatpush.msra.mxu2 %v66_v47  ;;  %v78_v8 = vld [vmem:[%s1851_s1 + $0x188] sm:$0xff]  ;;  %v77_v12 = vld [vmem:[%s1851_s1 + $0x180] sm:$0xff]  ;;  %v119_v14 = vld [vmem:[%s1851_s1 + $0x2d0] sm:$0xff] }
  0x1b   :  { %186 = vmatpush.msra.mxu1 %v48_v42  ;;  %224 = vmatpush.msra.mxu3 %v82_v52  ;;  %v102_v15 = vld [vmem:[%s1851_s1 + $0x248] sm:$0xff]  ;;  %v128_v16 = vld [vmem:[%s1851_s1 + $0x318] sm:$0xff]  ;;  %v127_v20 = vld [vmem:[%s1851_s1 + $0x310] sm:$0xff] }
  0x1c   :  { %167 = vmatpush.msra.mxu0 %v31_v45  ;;  %205 = vmatpush.msra.mxu2 %v65_v51  ;;  %v140_v11 = vld.sshfl [vmem:[#allocation1 + $0x10] sm:$0xff pattern:$0x73625140]  ;;  %v138_v17 = vld.sshfl [vmem:[#allocation1] sm:$0xff pattern:$0x73625140] }
  0x1d   :  { %187 = vmatpush.msra.mxu1 %v47_v46  ;;  %225 = vmatpush.msra.mxu3 %v81_v59  ;;  %v118_v18 = vld [vmem:[%s1851_s1 + $0x2c8] sm:$0xff]  ;;  %v141_v19 = vld.sshfl [vmem:[#allocation1 + $0x18] sm:$0xff pattern:$0x73625140] }
  0x1e   :  { %168 = vmatpush.msra.mxu0 %v30_v49  ;;  %206 = vmatpush.msra.mxu2 %v64_v58 }
  0x1f   :  { %188 = vmatpush.msra.mxu1 %v46_v50  ;;  %226 = vmatpush.msra.mxu3 %v80_v63 }
  0x20   :  { %169 = vmatpush.msra.mxu0 %v29_v53  ;;  %207 = vmatpush.msra.mxu2 %v63_v62 }
  0x21   :  { %189 = vmatpush.msra.mxu1 %v45_v54  ;;  %227 = vmatpush.msra.mxu3 %v79_v4 }
  0x22   :  { %234 = vmatpush.msrb.mxu0 %v108_v56  ;;  %208 = vmatpush.msra.mxu2 %v62_v3 }
  0x23   :  { %254 = vmatpush.msrb.mxu1 %v124_v57  ;;  %228 = vmatpush.msra.mxu3 %v78_v8 }
  0x24   :  { %235 = vmatpush.msrb.mxu0 %v107_v60  ;;  %209 = vmatpush.msra.mxu2 %v61_v7 }
  0x25   :  { %255 = vmatpush.msrb.mxu1 %v123_v61  ;;  %210 = vmatmul.f32.vlgmr.msra.gmra.mxu2 %v140_v11 }
  0x26   :  { %236 = vmatpush.msrb.mxu0 %v106_v1  ;;  %229 = vmatpush.msra.mxu3 %v77_v12 }
  0x27   :  { %256 = vmatpush.msrb.mxu1 %v122_v2 }
  0x28   :  { %237 = vmatpush.msrb.mxu0 %v105_v5 }
  0x29   :  { %257 = vmatpush.msrb.mxu1 %v121_v6 }
  0x2a   :  { %238 = vmatpush.msrb.mxu0 %v104_v9 }
  0x2b   :  { %258 = vmatpush.msrb.mxu1 %v120_v10 }
  0x2c   :  { %239 = vmatpush.msrb.mxu0 %v103_v13 }
  0x2d   :  { %259 = vmatpush.msrb.mxu1 %v119_v14 }
  0x2e   :  { %12 = vsyncpa [#allocation3], 0  ;;  %v101_v21 = vld [vmem:[%s1851_s1 + $0x240] sm:$0xff]  ;;  %286 = vmatpush.msrb.mxu2 %v128_v16  ;;  %170 = vmatmul.f32.vlgmr.msra.gmra.mxu0 %v138_v17  ;;  %v139_v23 = vld.sshfl [vmem:[#allocation1 + $0x8] sm:$0xff pattern:$0x73625140] }
  0x2f   :  { %v117_v22 = vld [vmem:[%s1851_s1 + $0x2c0] sm:$0xff]  ;;  %240 = vmatpush.msrb.mxu0 %v102_v15  ;;  %260 = vmatpush.msrb.mxu1 %v118_v18  ;;  %v126_v24 = vld [vmem:[%s1851_s1 + $0x308] sm:$0xff]  ;;  %v100_v25 = vld [vmem:[%s1851_s1 + $0x238] sm:$0xff]  ;;  %vm151_vm0 = vcmask 261120   ;;  %vm377_vm1 = vcmask 523264   ;;  %s897_s13 = smov [#allocation2]  }
  0x30   :  { %v116_v26 = vld [vmem:[%s1851_s1 + $0x2b8] sm:$0xff]  ;;  %230 = vmatmul.f32.vlgmr.msra.gmra.mxu3 %v141_v19  ;;  %287 = vmatpush.msrb.mxu2 %v127_v20  ;;  %v125_v27 = vld [vmem:[%s1851_s1 + $0x300] sm:$0xff]  ;;  %v99_v29 = vld [vmem:[%s1851_s1 + $0x230] sm:$0xff]  ;;  %s848_s14 = sshll.u32 %s897_s13, 4  ;;  %s850_s17 = sshll.u32 %s1857_s7, 4  ;;  %vm841_vm2 = vcmask 91136   ;;  %s849_s14 = int_to_ptr.vmem [resolvable:$true] %s848_s14  ;;  %s851_s17 = int_to_ptr.hbm [resolvable:$true] %s850_s17 }
  0x31   :  { %241 = vmatpush.msrb.mxu0 %v101_v21  ;;  %261 = vmatpush.msrb.mxu1 %v117_v22  ;;  %v351_v28 = vld [vmem:[%s1853_s3 + $0x1c0] sm:$0xff]  ;;  %v115_v30 = vld [vmem:[%s1851_s1 + $0x2b0] sm:$0xff]  ;;  %v98_v33 = vld [vmem:[%s1851_s1 + $0x228] sm:$0xff] }
  0x32   :  { %190 = vmatmul.f32.vlgmr.msra.gmra.mxu1 %v139_v23  ;;  %288 = vmatpush.msrb.mxu2 %v126_v24  ;;  %v144_v31 = vld.sshfl [vmem:[#allocation1 + $0x30] sm:$0xff pattern:$0x73625140]  ;;  %v343_v32 = vld [vmem:[%s1853_s3 + $0x180] sm:$0xff]  ;;  %v114_v34 = vld [vmem:[%s1851_s1 + $0x2a8] sm:$0xff] }
  0x33   :  { %242 = vmatpush.msrb.mxu0 %v100_v25  ;;  %262 = vmatpush.msrb.mxu1 %v116_v26  ;;  %v352_v35 = vld [vmem:[%s1853_s3 + $0x1c8] sm:$0xff]  ;;  %v335_v36 = vld [vmem:[%s1853_s3 + $0x140] sm:$0xff]  ;;  %v96_v41 = vld [vmem:[%s1851_s1 + $0x218] sm:$0xff] }
  0x34   :  { %289 = vmatpush.msrb.mxu2 %v125_v27  ;;  %389 = vmatpush.msrb.mxu3 %v351_v28  ;;  %v97_v37 = vld [vmem:[%s1851_s1 + $0x220] sm:$0xff]  ;;  %v344_v39 = vld [vmem:[%s1853_s3 + $0x188] sm:$0xff]  ;;  %v112_v42 = vld [vmem:[%s1851_s1 + $0x298] sm:$0xff] }
  0x35   :  { %243 = vmatpush.msrb.mxu0 %v99_v29  ;;  %263 = vmatpush.msrb.mxu1 %v115_v30  ;;  %v113_v38 = vld [vmem:[%s1851_s1 + $0x2a0] sm:$0xff]  ;;  %v336_v43 = vld [vmem:[%s1853_s3 + $0x148] sm:$0xff]  ;;  %v95_v45 = vld [vmem:[%s1851_s1 + $0x210] sm:$0xff] }
  0x36   :  { %859 = vmatmul.msk.f32.vlgmr.msrb.gmra.mxu2 %vm151_vm0, %v144_v31  ;;  %390 = vmatpush.msrb.mxu3 %v343_v32  ;;  %v327_v40 = vld [vmem:[%s1853_s3 + $0x100] sm:$0xff]  ;;  %v111_v46 = vld [vmem:[%s1851_s1 + $0x290] sm:$0xff]  ;;  %v328_v47 = vld [vmem:[%s1853_s3 + $0x108] sm:$0xff] }
  0x37   :  { %244 = vmatpush.msrb.mxu0 %v98_v33  ;;  %264 = vmatpush.msrb.mxu1 %v114_v34  ;;  %v319_v44 = vld [vmem:[%s1853_s3 + $0xc0] sm:$0xff]  ;;  %v94_v49 = vld [vmem:[%s1851_s1 + $0x208] sm:$0xff]  ;;  %v353_v63 = vld [vmem:[%s1853_s3 + $0x1d0] sm:$0xff] }
  0x38   :  { %409 = vmatpush.msra.mxu2 %v352_v35  ;;  %391 = vmatpush.msrb.mxu3 %v335_v36  ;;  %v311_v48 = vld [vmem:[%s1853_s3 + $0x80] sm:$0xff]  ;;  %v110_v50 = vld [vmem:[%s1851_s1 + $0x288] sm:$0xff]  ;;  %v354_v0 = vld [vmem:[%s1853_s3 + $0x1d8] sm:$0xff] }
  0x39   :  { %245 = vmatpush.msrb.mxu0 %v97_v37  ;;  %265 = vmatpush.msrb.mxu1 %v113_v38  ;;  %v320_v51 = vld [vmem:[%s1853_s3 + $0xc8] sm:$0xff]  ;;  %v93_v52 = vld [vmem:[%s1851_s1 + $0x200] sm:$0xff]  ;;  %v345_v3 = vld [vmem:[%s1853_s3 + $0x190] sm:$0xff] }
  0x3a   :  { %410 = vmatpush.msra.mxu2 %v344_v39  ;;  %392 = vmatpush.msrb.mxu3 %v327_v40  ;;  %v109_v53 = vld [vmem:[%s1851_s1 + $0x280] sm:$0xff]  ;;  %v143_v55 = vld.sshfl [vmem:[#allocation1 + $0x28] sm:$0xff pattern:$0x73625140]  ;;  %v346_v4 = vld [vmem:[%s1853_s3 + $0x198] sm:$0xff] }
  0x3b   :  { %246 = vmatpush.msrb.mxu0 %v96_v41  ;;  %266 = vmatpush.msrb.mxu1 %v112_v42  ;;  %v142_v54 = vld.sshfl [vmem:[#allocation1 + $0x20] sm:$0xff pattern:$0x73625140]  ;;  %v312_v56 = vld [vmem:[%s1853_s3 + $0x88] sm:$0xff]  ;;  %v337_v7 = vld [vmem:[%s1853_s3 + $0x150] sm:$0xff] }
  0x3c   :  { %411 = vmatpush.msra.mxu2 %v336_v43  ;;  %393 = vmatpush.msrb.mxu3 %v319_v44  ;;  %v303_v57 = vld [vmem:[%s1853_s3 + $0x40] sm:$0xff]  ;;  %v304_v58 = vld [vmem:[%s1853_s3 + $0x48] sm:$0xff]  ;;  %v338_v8 = vld [vmem:[%s1853_s3 + $0x158] sm:$0xff] }
  0x3d   :  { %247 = vmatpush.msrb.mxu0 %v95_v45  ;;  %267 = vmatpush.msrb.mxu1 %v111_v46  ;;  %v295_v59 = vld [vmem:[%s1853_s3] sm:$0xff]  ;;  %v296_v60 = vld [vmem:[%s1853_s3 + $0x8] sm:$0xff]  ;;  %v329_v11 = vld [vmem:[%s1853_s3 + $0x110] sm:$0xff] }
  0x3e   :  { %412 = vmatpush.msra.mxu2 %v328_v47  ;;  %394 = vmatpush.msrb.mxu3 %v311_v48  ;;  %v355_v61 = vld [vmem:[%s1853_s3 + $0x1e0] sm:$0xff]  ;;  %v356_v62 = vld [vmem:[%s1853_s3 + $0x1e8] sm:$0xff]  ;;  %v330_v12 = vld [vmem:[%s1853_s3 + $0x118] sm:$0xff] }
  0x3f   :  { %248 = vmatpush.msrb.mxu0 %v94_v49  ;;  %268 = vmatpush.msrb.mxu1 %v110_v50  ;;  %v347_v1 = vld [vmem:[%s1853_s3 + $0x1a0] sm:$0xff]  ;;  %v348_v2 = vld [vmem:[%s1853_s3 + $0x1a8] sm:$0xff]  ;;  %v321_v15 = vld [vmem:[%s1853_s3 + $0xd0] sm:$0xff] }
  0x40   :  { %413 = vmatpush.msra.mxu2 %v320_v51  ;;  %395 = vmatpush.msrb.mxu3 %v303_v57  ;;  %v339_v5 = vld [vmem:[%s1853_s3 + $0x160] sm:$0xff]  ;;  %v340_v6 = vld [vmem:[%s1853_s3 + $0x168] sm:$0xff]  ;;  %v322_v16 = vld [vmem:[%s1853_s3 + $0xd8] sm:$0xff] }
  0x41   :  { %249 = vmatpush.msrb.mxu0 %v93_v52  ;;  %269 = vmatpush.msrb.mxu1 %v109_v53  ;;  %v331_v9 = vld [vmem:[%s1853_s3 + $0x120] sm:$0xff]  ;;  %v332_v10 = vld [vmem:[%s1853_s3 + $0x128] sm:$0xff]  ;;  %v313_v19 = vld [vmem:[%s1853_s3 + $0x90] sm:$0xff] }
  0x42   :  { %250 = vmatmul.f32.vlgmr.msrb.gmra.mxu0 %v142_v54  ;;  %270 = vmatmul.f32.vlgmr.msrb.gmra.mxu1 %v143_v55  ;;  %v323_v13 = vld [vmem:[%s1853_s3 + $0xe0] sm:$0xff]  ;;  %v324_v14 = vld [vmem:[%s1853_s3 + $0xe8] sm:$0xff]  ;;  %v314_v20 = vld [vmem:[%s1853_s3 + $0x98] sm:$0xff] }
  0x43   :  { %414 = vmatpush.msra.mxu2 %v312_v56  ;;  %396 = vmatpush.msrb.mxu3 %v295_v59  ;;  %v315_v17 = vld [vmem:[%s1853_s3 + $0xa0] sm:$0xff]  ;;  %v316_v18 = vld [vmem:[%s1853_s3 + $0xa8] sm:$0xff]  ;;  %v305_v23 = vld [vmem:[%s1853_s3 + $0x50] sm:$0xff] }
  0x44   :  { %469 = vmatpush.msra.mxu0 %v355_v61  ;;  %489 = vmatpush.msra.mxu1 %v356_v62  ;;  %v307_v21 = vld [vmem:[%s1853_s3 + $0x60] sm:$0xff]  ;;  %v308_v22 = vld [vmem:[%s1853_s3 + $0x68] sm:$0xff]  ;;  %v306_v24 = vld [vmem:[%s1853_s3 + $0x58] sm:$0xff] }
  0x45   :  { %415 = vmatpush.msra.mxu2 %v304_v58  ;;  %429 = vmatpush.msra.mxu3 %v353_v63  ;;  %v299_v25 = vld [vmem:[%s1853_s3 + $0x20] sm:$0xff]  ;;  %v300_v26 = vld [vmem:[%s1853_s3 + $0x28] sm:$0xff]  ;;  %v297_v27 = vld [vmem:[%s1853_s3 + $0x10] sm:$0xff] }
  0x46   :  { %470 = vmatpush.msra.mxu0 %v347_v1  ;;  %490 = vmatpush.msra.mxu1 %v348_v2  ;;  %v298_v28 = vld [vmem:[%s1853_s3 + $0x18] sm:$0xff]  ;;  %v869_v29 = vld [vmem:[%s1852_s2] ss:$0 sm:$0xff]  ;;  %v563_v39 = vld [vmem:[%s1855_s5 + $0x70] sm:$0xff] }
  0x47   :  { %416 = vmatpush.msra.mxu2 %v296_v60  ;;  %430 = vmatpush.msra.mxu3 %v345_v3  ;;  %v564_v37 = vld [vmem:[%s1855_s5 + $0x78] sm:$0xff]  ;;  %v579_v40 = vld [vmem:[%s1855_s5 + $0xf0] sm:$0xff]  ;;  %v562_v41 = vld [vmem:[%s1855_s5 + $0x68] sm:$0xff] }
  0x48   :  { %471 = vmatpush.msra.mxu0 %v339_v5  ;;  %491 = vmatpush.msra.mxu1 %v340_v6  ;;  %v580_v38 = vld [vmem:[%s1855_s5 + $0xf8] sm:$0xff]  ;;  %v578_v42 = vld [vmem:[%s1855_s5 + $0xe8] sm:$0xff]  ;;  %v561_v44 = vld [vmem:[%s1855_s5 + $0x60] sm:$0xff] }
  0x49   :  { %449 = vmatpush.msrb.mxu2 %v354_v0  ;;  %431 = vmatpush.msra.mxu3 %v337_v7  ;;  %v577_v45 = vld [vmem:[%s1855_s5 + $0xe0] sm:$0xff]  ;;  %v560_v48 = vld [vmem:[%s1855_s5 + $0x58] sm:$0xff]  ;;  %v559_v52 = vld [vmem:[%s1855_s5 + $0x50] sm:$0xff] }
  0x4a   :  { %472 = vmatpush.msra.mxu0 %v331_v9  ;;  %492 = vmatpush.msra.mxu1 %v332_v10  ;;  %v576_v49 = vld [vmem:[%s1855_s5 + $0xd8] sm:$0xff]  ;;  %v575_v53 = vld [vmem:[%s1855_s5 + $0xd0] sm:$0xff]  ;;  %v558_v55 = vld [vmem:[%s1855_s5 + $0x48] sm:$0xff] }
  0x4b   :  { %450 = vmatpush.msrb.mxu2 %v346_v4  ;;  %432 = vmatpush.msra.mxu3 %v329_v11  ;;  %v574_v56 = vld [vmem:[%s1855_s5 + $0xc8] sm:$0xff]  ;;  %v357_v59 = vld [vmem:[%s1853_s3 + $0x1f0] sm:$0xff]  ;;  %v358_v60 = vld [vmem:[%s1853_s3 + $0x1f8] sm:$0xff] }
  0x4c   :  { %473 = vmatpush.msra.mxu0 %v323_v13  ;;  %493 = vmatpush.msra.mxu1 %v324_v14  ;;  %v557_v61 = vld [vmem:[%s1855_s5 + $0x40] sm:$0xff]  ;;  %v349_v63 = vld [vmem:[%s1853_s3 + $0x1b0] sm:$0xff]  ;;  %v350_v0 = vld [vmem:[%s1853_s3 + $0x1b8] sm:$0xff] }
  0x4d   :  { %451 = vmatpush.msrb.mxu2 %v338_v8  ;;  %433 = vmatpush.msra.mxu3 %v321_v15  ;;  %v573_v62 = vld [vmem:[%s1855_s5 + $0xc0] sm:$0xff]  ;;  %v556_v1 = vld [vmem:[%s1855_s5 + $0x38] sm:$0xff]  ;;  %v341_v3 = vld [vmem:[%s1853_s3 + $0x170] sm:$0xff] }
  0x4e   :  { %474 = vmatpush.msra.mxu0 %v315_v17  ;;  %494 = vmatpush.msra.mxu1 %v316_v18  ;;  %v572_v2 = vld [vmem:[%s1855_s5 + $0xb8] sm:$0xff]  ;;  %v555_v5 = vld [vmem:[%s1855_s5 + $0x30] sm:$0xff]  ;;  %v554_v11 = vld [vmem:[%s1855_s5 + $0x28] sm:$0xff] }
  0x4f   :  { %452 = vmatpush.msrb.mxu2 %v330_v12  ;;  %434 = vmatpush.msra.mxu3 %v313_v19  ;;  %v342_v4 = vld [vmem:[%s1853_s3 + $0x178] sm:$0xff]  ;;  %v571_v6 = vld [vmem:[%s1855_s5 + $0xb0] sm:$0xff]  ;;  %v570_v12 = vld [vmem:[%s1855_s5 + $0xa8] sm:$0xff] }
  0x50   :  { %475 = vmatpush.msra.mxu0 %v307_v21  ;;  %495 = vmatpush.msra.mxu1 %v308_v22  ;;  %v333_v7 = vld [vmem:[%s1853_s3 + $0x130] sm:$0xff]  ;;  %v334_v8 = vld [vmem:[%s1853_s3 + $0x138] sm:$0xff]  ;;  %v553_v15 = vld [vmem:[%s1855_s5 + $0x20] sm:$0xff] }
  0x51   :  { %453 = vmatpush.msrb.mxu2 %v322_v16  ;;  %435 = vmatpush.msra.mxu3 %v305_v23  ;;  %v325_v9 = vld [vmem:[%s1853_s3 + $0xf0] sm:$0xff]  ;;  %v326_v10 = vld [vmem:[%s1853_s3 + $0xf8] sm:$0xff]  ;;  %v569_v16 = vld [vmem:[%s1855_s5 + $0xa0] sm:$0xff] }
  0x52   :  { %476 = vmatpush.msra.mxu0 %v299_v25  ;;  %496 = vmatpush.msra.mxu1 %v300_v26  ;;  %v317_v13 = vld [vmem:[%s1853_s3 + $0xb0] sm:$0xff]  ;;  %v318_v14 = vld [vmem:[%s1853_s3 + $0xb8] sm:$0xff] }
  0x53   :  { %454 = vmatpush.msrb.mxu2 %v314_v20  ;;  %436 = vmatpush.msra.mxu3 %v297_v27  ;;  %v309_v17 = vld [vmem:[%s1853_s3 + $0x70] sm:$0xff]  ;;  %v310_v18 = vld [vmem:[%s1853_s3 + $0x78] sm:$0xff] }
  0x54   :  { %681 = vmatpush.msrb.mxu0 %v564_v37  ;;  %701 = vmatpush.msrb.mxu1 %v580_v38  ;;  %v552_v19 = vld [vmem:[%s1855_s5 + $0x18] sm:$0xff]  ;;  %v301_v21 = vld [vmem:[%s1853_s3 + $0x30] sm:$0xff] }
  0x55   :  { %455 = vmatpush.msrb.mxu2 %v306_v24  ;;  %v568_v20 = vld [vmem:[%s1855_s5 + $0x98] sm:$0xff]  ;;  %v551_v25 = vld [vmem:[%s1855_s5 + $0x10] sm:$0xff] }
  0x56   :  { %682 = vmatpush.msrb.mxu0 %v563_v39  ;;  %702 = vmatpush.msrb.mxu1 %v579_v40  ;;  %v302_v22 = vld [vmem:[%s1853_s3 + $0x38] sm:$0xff]  ;;  %v567_v26 = vld [vmem:[%s1855_s5 + $0x90] sm:$0xff] }
  0x57   :  { %456 = vmatpush.msrb.mxu2 %v298_v28  ;;  %v596_v23 = vld [vmem:[%s1855_s5 + $0x178] sm:$0xff]  ;;  %v595_v27 = vld [vmem:[%s1855_s5 + $0x170] sm:$0xff] }
  0x58   :  { %683 = vmatpush.msrb.mxu0 %v562_v41  ;;  %703 = vmatpush.msrb.mxu1 %v578_v42  ;;  %v612_v24 = vld [vmem:[%s1855_s5 + $0x1f8] sm:$0xff]  ;;  %v611_v28 = vld [vmem:[%s1855_s5 + $0x1f0] sm:$0xff] }
  0x59   :  { %v628_v37 = vld [vmem:[%s1855_s5 + $0x278] sm:$0xff]  ;;  %v627_v41 = vld [vmem:[%s1855_s5 + $0x270] sm:$0xff] }
  0x5a   :  { %684 = vmatpush.msrb.mxu0 %v561_v44  ;;  %704 = vmatpush.msrb.mxu1 %v577_v45  ;;  %v644_v38 = vld [vmem:[%s1855_s5 + $0x2f8] sm:$0xff]  ;;  %v643_v42 = vld [vmem:[%s1855_s5 + $0x2f0] sm:$0xff]  ;;  %v626_v45 = vld [vmem:[%s1855_s5 + $0x268] sm:$0xff] }
  0x5b   :  { %v592_v39 = vld [vmem:[%s1855_s5 + $0x158] sm:$0xff]  ;;  %v607_v44 = vld [vmem:[%s1855_s5 + $0x1d0] sm:$0xff] }
  0x5c   :  { %685 = vmatpush.msrb.mxu0 %v560_v48  ;;  %705 = vmatpush.msrb.mxu1 %v576_v49  ;;  %v608_v40 = vld [vmem:[%s1855_s5 + $0x1d8] sm:$0xff]  ;;  %v606_v48 = vld [vmem:[%s1855_s5 + $0x1c8] sm:$0xff]  ;;  %v625_v49 = vld [vmem:[%s1855_s5 + $0x260] sm:$0xff] }
  0x5e   :  { %686 = vmatpush.msrb.mxu0 %v559_v52  ;;  %706 = vmatpush.msrb.mxu1 %v575_v53  ;;  %v605_v52 = vld [vmem:[%s1855_s5 + $0x1c0] sm:$0xff]  ;;  %v624_v53 = vld [vmem:[%s1855_s5 + $0x258] sm:$0xff] }
  0x60   :  { %687 = vmatpush.msrb.mxu0 %v558_v55  ;;  %707 = vmatpush.msrb.mxu1 %v574_v56  ;;  %v588_v55 = vld [vmem:[%s1855_s5 + $0x138] sm:$0xff] }
  0x61   :  { %v604_v56 = vld [vmem:[%s1855_s5 + $0x1b8] sm:$0xff] }
  0x62   :  { %688 = vmatpush.msrb.mxu0 %v557_v61  ;;  %708 = vmatpush.msrb.mxu1 %v573_v62  ;;  %v586_v61 = vld [vmem:[%s1855_s5 + $0x128] sm:$0xff] }
  0x63   :  { %v602_v62 = vld [vmem:[%s1855_s5 + $0x1a8] sm:$0xff] }
  0x64   :  { %689 = vmatpush.msrb.mxu0 %v556_v1  ;;  %709 = vmatpush.msrb.mxu1 %v572_v2  ;;  %v584_v1 = vld [vmem:[%s1855_s5 + $0x118] sm:$0xff] }
  0x65   :  { %v600_v2 = vld [vmem:[%s1855_s5 + $0x198] sm:$0xff] }
  0x66   :  { %690 = vmatpush.msrb.mxu0 %v555_v5  ;;  %710 = vmatpush.msrb.mxu1 %v571_v6  ;;  %v582_v5 = vld [vmem:[%s1855_s5 + $0x108] sm:$0xff] }
  0x67   :  { %v598_v6 = vld [vmem:[%s1855_s5 + $0x188] sm:$0xff] }
  0x68   :  { %691 = vmatpush.msrb.mxu0 %v554_v11  ;;  %711 = vmatpush.msrb.mxu1 %v570_v12  ;;  %v659_v11 = vld [vmem:[%s1855_s5 + $0x370] sm:$0xff] }
  0x69   :  { %v675_v12 = vld [vmem:[%s1855_s5 + $0x3f0] sm:$0xff] }
  0x6a   :  { %692 = vmatpush.msrb.mxu0 %v553_v15  ;;  %712 = vmatpush.msrb.mxu1 %v569_v16  ;;  %v658_v15 = vld [vmem:[%s1855_s5 + $0x368] sm:$0xff] }
  0x6b   :  { %v674_v16 = vld [vmem:[%s1855_s5 + $0x3e8] sm:$0xff] }
  0x6c   :  { %693 = vmatpush.msrb.mxu0 %v552_v19  ;;  %713 = vmatpush.msrb.mxu1 %v568_v20  ;;  %v657_v19 = vld [vmem:[%s1855_s5 + $0x360] sm:$0xff] }
  0x6d   :  { %v673_v20 = vld [vmem:[%s1855_s5 + $0x3e0] sm:$0xff] }
  0x6e   :  { %694 = vmatpush.msrb.mxu0 %v551_v25  ;;  %714 = vmatpush.msrb.mxu1 %v567_v26  ;;  %v619_v25 = vld [vmem:[%s1855_s5 + $0x230] sm:$0xff] }
  0x6f   :  { %v635_v26 = vld [vmem:[%s1855_s5 + $0x2b0] sm:$0xff] }
  0xa8   :  { %v211_v34 = vpop.f32.mrf.mxu2 }
  0xab   :  { %v171_v30 = vpop.f32.mrf.mxu0 }
  0xac   :  { %v172_v31 = vadd.f32 %v869_v29, %v171_v30  ;;  %v550_v29 = vld [vmem:[%s1855_s5 + $0x8] sm:$0xff] }
  0xad   :  { %v566_v30 = vld [vmem:[%s1855_s5 + $0x88] sm:$0xff]  ;;  %695 = vmatpush.msrb.mxu0 %v550_v29 }
  0xae   :  { %715 = vmatpush.msrb.mxu1 %v566_v30  ;;  %v618_v29 = vld [vmem:[%s1855_s5 + $0x228] sm:$0xff] }
  0xaf   :  { %v191_v32 = vpop.f32.mrf.mxu1  ;;  %v634_v30 = vld [vmem:[%s1855_s5 + $0x2a8] sm:$0xff] }
  0xb0   :  { %v192_v33 = vadd.f32 %v191_v32, %v172_v31  ;;  %v594_v31 = vld [vmem:[%s1855_s5 + $0x168] sm:$0xff] }
  0xb1   :  { %v610_v32 = vld [vmem:[%s1855_s5 + $0x1e8] sm:$0xff] }
  0xb2   :  { %v212_v35 = vadd.f32 %v211_v34, %v192_v33  ;;  %v549_v33 = vld [vmem:[%s1855_s5] sm:$0xff] }
  0xb3   :  { %v231_v36 = vpop.f32.mrf.mxu3  ;;  %v565_v34 = vld [vmem:[%s1855_s5 + $0x80] sm:$0xff]  ;;  %696 = vmatpush.msrb.mxu0 %v549_v33 }
  0xb4   :  { %v232_v43 = vadd.f32 %v231_v36, %v212_v35  ;;  %v593_v35 = vld [vmem:[%s1855_s5 + $0x160] sm:$0xff]  ;;  %716 = vmatpush.msrb.mxu1 %v565_v34 }
  0xb5   :  { %v609_v36 = vld [vmem:[%s1855_s5 + $0x1e0] sm:$0xff] }
  0xb6   :  { %v617_v33 = vld [vmem:[%s1855_s5 + $0x220] sm:$0xff] }
  0xb7   :  { %v633_v34 = vld [vmem:[%s1855_s5 + $0x2a0] sm:$0xff] }
  0xb9   :  { %v291_v51 = vpop.f32.mrf.mxu2 }
  0xbf   :  { %v251_v46 = vpop.f32.mrf.mxu0  ;;  %v271_v47 = vpop.f32.mrf.mxu1 }
  0xc0   :  { %v252_v50 = vadd.f32 %v251_v46, %v232_v43  ;;  %v591_v43 = vld [vmem:[%s1855_s5 + $0x150] sm:$0xff]  ;;  %v642_v46 = vld [vmem:[%s1855_s5 + $0x2e8] sm:$0xff] }
  0xc2   :  { %v272_v54 = vadd.f32 %v271_v47, %v252_v50  ;;  %v590_v47 = vld [vmem:[%s1855_s5 + $0x148] sm:$0xff]  ;;  %v641_v50 = vld [vmem:[%s1855_s5 + $0x2e0] sm:$0xff] }
  0xc4   :  { %v292_v57 = vadd.f32 %v291_v51, %v272_v54  ;;  %v589_v51 = vld [vmem:[%s1855_s5 + $0x140] sm:$0xff]  ;;  %v640_v54 = vld [vmem:[%s1855_s5 + $0x2d8] sm:$0xff] }
  0xc6   :  { %v1433_v58 = vmax.f32 %v292_v57, 0.0  ;;  %v623_v57 = vld [vmem:[%s1855_s5 + $0x250] sm:$0xff] }
  0xc8   :  { %860 = vmatmul.msk.f32.vlgmr.msrb.gmra.mxu3 %vm377_vm1, %v1433_v58  ;;  %861 = vmatmul.msk.f32.vlgmr.msra.gmra.mxu2 %vm377_vm1, %v1433_v58 }
  0xc9   :  { %864 = vmatmul.msk.f32.vlgmr.msra.gmra.mxu0 %vm377_vm1, %v1433_v58  ;;  %865 = vmatmul.msk.f32.vlgmr.msra.gmra.mxu1 %vm377_vm1, %v1433_v58 }
  0xca   :  { %509 = vmatpush.msrb.mxu3 %v357_v59  ;;  %529 = vmatpush.msra.mxu2 %v358_v60  ;;  %v587_v59 = vld [vmem:[%s1855_s5 + $0x130] sm:$0xff] }
  0xcb   :  { %761 = vmatpush.msra.mxu0 %v628_v37  ;;  %781 = vmatpush.msra.mxu1 %v644_v38  ;;  %v603_v60 = vld [vmem:[%s1855_s5 + $0x1b0] sm:$0xff]  ;;  %v616_v37 = vld [vmem:[%s1855_s5 + $0x218] sm:$0xff] }
  0xcc   :  { %510 = vmatpush.msrb.mxu3 %v349_v63  ;;  %530 = vmatpush.msra.mxu2 %v350_v0  ;;  %v585_v63 = vld [vmem:[%s1855_s5 + $0x120] sm:$0xff]  ;;  %v632_v38 = vld [vmem:[%s1855_s5 + $0x298] sm:$0xff] }
  0xcd   :  { %762 = vmatpush.msra.mxu0 %v627_v41  ;;  %782 = vmatpush.msra.mxu1 %v643_v42  ;;  %v601_v0 = vld [vmem:[%s1855_s5 + $0x1a0] sm:$0xff]  ;;  %v615_v41 = vld [vmem:[%s1855_s5 + $0x210] sm:$0xff] }
  0xce   :  { %511 = vmatpush.msrb.mxu3 %v341_v3  ;;  %531 = vmatpush.msra.mxu2 %v342_v4  ;;  %v583_v3 = vld [vmem:[%s1855_s5 + $0x110] sm:$0xff] }
  0xcf   :  { %763 = vmatpush.msra.mxu0 %v626_v45  ;;  %783 = vmatpush.msra.mxu1 %v642_v46  ;;  %v599_v4 = vld [vmem:[%s1855_s5 + $0x190] sm:$0xff]  ;;  %v614_v45 = vld [vmem:[%s1855_s5 + $0x208] sm:$0xff] }
  0xd0   :  { %512 = vmatpush.msrb.mxu3 %v333_v7  ;;  %532 = vmatpush.msra.mxu2 %v334_v8  ;;  %v581_v7 = vld [vmem:[%s1855_s5 + $0x100] sm:$0xff]  ;;  %v631_v42 = vld [vmem:[%s1855_s5 + $0x290] sm:$0xff]  ;;  %v630_v46 = vld [vmem:[%s1855_s5 + $0x288] sm:$0xff] }
  0xd1   :  { %862 = vmatmul.msk.f32.vlgmr.msra.gmra.mxu3 %vm377_vm1, %v1433_v58  ;;  %863 = vmatmul.msk.f32.vlgmr.msrb.gmra.mxu2 %vm377_vm1, %v1433_v58  ;;  %v597_v8 = vld [vmem:[%s1855_s5 + $0x180] sm:$0xff] }
  0xd2   :  { %513 = vmatpush.msrb.mxu3 %v325_v9  ;;  %533 = vmatpush.msra.mxu2 %v326_v10  ;;  %v660_v9 = vld [vmem:[%s1855_s5 + $0x378] sm:$0xff] }
  0xd3   :  { %764 = vmatpush.msra.mxu0 %v625_v49  ;;  %784 = vmatpush.msra.mxu1 %v641_v50  ;;  %v676_v10 = vld [vmem:[%s1855_s5 + $0x3f8] sm:$0xff]  ;;  %v613_v49 = vld [vmem:[%s1855_s5 + $0x200] sm:$0xff] }
  0xd4   :  { %514 = vmatpush.msrb.mxu3 %v317_v13  ;;  %534 = vmatpush.msra.mxu2 %v318_v14  ;;  %v622_v13 = vld [vmem:[%s1855_s5 + $0x248] sm:$0xff]  ;;  %v629_v50 = vld [vmem:[%s1855_s5 + $0x280] sm:$0xff] }
  0xd5   :  { %765 = vmatpush.msra.mxu0 %v624_v53  ;;  %785 = vmatpush.msra.mxu1 %v640_v54  ;;  %v638_v14 = vld [vmem:[%s1855_s5 + $0x2c8] sm:$0xff]  ;;  %v648_v53 = vld [vmem:[%s1855_s5 + $0x318] sm:$0xff] }
  0xd6   :  { %515 = vmatpush.msrb.mxu3 %v309_v17  ;;  %535 = vmatpush.msra.mxu2 %v310_v18  ;;  %v621_v17 = vld [vmem:[%s1855_s5 + $0x240] sm:$0xff]  ;;  %v664_v54 = vld [vmem:[%s1855_s5 + $0x398] sm:$0xff] }
  0xd7   :  { %766 = vmatpush.msra.mxu0 %v623_v57  ;;  %v637_v18 = vld [vmem:[%s1855_s5 + $0x2c0] sm:$0xff]  ;;  %v646_v57 = vld [vmem:[%s1855_s5 + $0x308] sm:$0xff] }
  0xd8   :  { %516 = vmatpush.msrb.mxu3 %v301_v21  ;;  %536 = vmatpush.msra.mxu2 %v302_v22  ;;  %v620_v21 = vld [vmem:[%s1855_s5 + $0x238] sm:$0xff] }
  0xd9   :  { %866 = vmatmul.msk.f32.vlgmr.msrb.gmra.mxu3 %vm377_vm1, %v1433_v58  ;;  %867 = vmatmul.msk.f32.vlgmr.msra.gmra.mxu2 %vm377_vm1, %v1433_v58  ;;  %v639_v58 = vld [vmem:[%s1855_s5 + $0x2d0] sm:$0xff]  ;;  %v636_v22 = vld [vmem:[%s1855_s5 + $0x2b8] sm:$0xff] }
  0xda   :  { %721 = vmatpush.msra.mxu3 %v596_v23  ;;  %741 = vmatpush.msrb.mxu2 %v612_v24  ;;  %v656_v23 = vld [vmem:[%s1855_s5 + $0x358] sm:$0xff] }
  0xdb   :  { %786 = vmatpush.msra.mxu1 %v639_v58  ;;  %767 = vmatpush.msra.mxu0 %v622_v13  ;;  %v672_v24 = vld [vmem:[%s1855_s5 + $0x3d8] sm:$0xff]  ;;  %v662_v58 = vld [vmem:[%s1855_s5 + $0x388] sm:$0xff] }
  0xdc   :  { %722 = vmatpush.msra.mxu3 %v595_v27  ;;  %742 = vmatpush.msrb.mxu2 %v611_v28  ;;  %v655_v27 = vld [vmem:[%s1855_s5 + $0x350] sm:$0xff] }
  0xdd   :  { %787 = vmatpush.msra.mxu1 %v638_v14  ;;  %768 = vmatpush.msra.mxu0 %v621_v17  ;;  %v671_v28 = vld [vmem:[%s1855_s5 + $0x3d0] sm:$0xff] }
  0xde   :  { %723 = vmatpush.msra.mxu3 %v594_v31  ;;  %743 = vmatpush.msrb.mxu2 %v610_v32  ;;  %v654_v31 = vld [vmem:[%s1855_s5 + $0x348] sm:$0xff] }
  0xdf   :  { %788 = vmatpush.msra.mxu1 %v637_v18  ;;  %769 = vmatpush.msra.mxu0 %v620_v21  ;;  %v670_v32 = vld [vmem:[%s1855_s5 + $0x3c8] sm:$0xff] }
  0xe0   :  { %724 = vmatpush.msra.mxu3 %v593_v35  ;;  %744 = vmatpush.msrb.mxu2 %v609_v36  ;;  %v653_v35 = vld [vmem:[%s1855_s5 + $0x340] sm:$0xff] }
  0xe1   :  { %789 = vmatpush.msra.mxu1 %v636_v22  ;;  %770 = vmatpush.msra.mxu0 %v619_v25  ;;  %v669_v36 = vld [vmem:[%s1855_s5 + $0x3c0] sm:$0xff] }
  0xe2   :  { %725 = vmatpush.msra.mxu3 %v592_v39  ;;  %745 = vmatpush.msrb.mxu2 %v608_v40  ;;  %v652_v39 = vld [vmem:[%s1855_s5 + $0x338] sm:$0xff] }
  0xe3   :  { %790 = vmatpush.msra.mxu1 %v635_v26  ;;  %771 = vmatpush.msra.mxu0 %v618_v29  ;;  %v668_v40 = vld [vmem:[%s1855_s5 + $0x3b8] sm:$0xff] }
  0xe4   :  { %726 = vmatpush.msra.mxu3 %v591_v43  ;;  %746 = vmatpush.msrb.mxu2 %v607_v44  ;;  %v651_v43 = vld [vmem:[%s1855_s5 + $0x330] sm:$0xff] }
  0xe5   :  { %791 = vmatpush.msra.mxu1 %v634_v30  ;;  %772 = vmatpush.msra.mxu0 %v617_v33  ;;  %v667_v44 = vld [vmem:[%s1855_s5 + $0x3b0] sm:$0xff]  ;;  %v870_v30 = vld [vmem:[%s1856_s6] ss:$0 sm:$0xff] }
  0xe6   :  { %727 = vmatpush.msra.mxu3 %v590_v47  ;;  %747 = vmatpush.msrb.mxu2 %v606_v48  ;;  %v650_v47 = vld [vmem:[%s1855_s5 + $0x328] sm:$0xff] }
  0xe7   :  { %792 = vmatpush.msra.mxu1 %v633_v34  ;;  %773 = vmatpush.msra.mxu0 %v616_v37  ;;  %v666_v48 = vld [vmem:[%s1855_s5 + $0x3a8] sm:$0xff] }
  0xe8   :  { %728 = vmatpush.msra.mxu3 %v589_v51  ;;  %748 = vmatpush.msrb.mxu2 %v605_v52  ;;  %v649_v51 = vld [vmem:[%s1855_s5 + $0x320] sm:$0xff] }
  0xe9   :  { %793 = vmatpush.msra.mxu1 %v632_v38  ;;  %774 = vmatpush.msra.mxu0 %v615_v41  ;;  %v665_v52 = vld [vmem:[%s1855_s5 + $0x3a0] sm:$0xff] }
  0xea   :  { %729 = vmatpush.msra.mxu3 %v588_v55  ;;  %749 = vmatpush.msrb.mxu2 %v604_v56  ;;  %v647_v55 = vld [vmem:[%s1855_s5 + $0x310] sm:$0xff] }
  0xeb   :  { %794 = vmatpush.msra.mxu1 %v631_v42  ;;  %775 = vmatpush.msra.mxu0 %v614_v45  ;;  %v663_v56 = vld [vmem:[%s1855_s5 + $0x390] sm:$0xff] }
  0xec   :  { %730 = vmatpush.msra.mxu3 %v587_v59  ;;  %750 = vmatpush.msrb.mxu2 %v603_v60  ;;  %v645_v59 = vld [vmem:[%s1855_s5 + $0x300] sm:$0xff] }
  0xed   :  { %795 = vmatpush.msra.mxu1 %v630_v46  ;;  %776 = vmatpush.msra.mxu0 %v613_v49  ;;  %v661_v60 = vld [vmem:[%s1855_s5 + $0x380] sm:$0xff] }
  0xee   :  { %731 = vmatpush.msra.mxu3 %v586_v61  ;;  %751 = vmatpush.msrb.mxu2 %v602_v62  ;;  %v359_v61 = vld [vmem:[%s1854_s4] sm:$0xff] }
  0xef   :  { %796 = vmatpush.msra.mxu1 %v629_v50  ;;  %v361_v62 = vperm.slane %v359_v61, 0  ;;  %v367_v22 = vperm.slane %v359_v61, 6 }
  0xf0   :  { %732 = vmatpush.msra.mxu3 %v585_v63  ;;  %752 = vmatpush.msrb.mxu2 %v601_v0  ;;  %v362_v63 = vperm.slane %v359_v61, 1 }
  0xf2   :  { %733 = vmatpush.msra.mxu3 %v584_v1  ;;  %753 = vmatpush.msrb.mxu2 %v600_v2 }
  0xf4   :  { %734 = vmatpush.msra.mxu3 %v583_v3  ;;  %754 = vmatpush.msrb.mxu2 %v599_v4  ;;  %v365_v4 = vperm.slane %v359_v61, 4 }
  0xf6   :  { %735 = vmatpush.msra.mxu3 %v582_v5  ;;  %755 = vmatpush.msrb.mxu2 %v598_v6  ;;  %v366_v5 = vperm.slane %v359_v61, 5 }
  0xf8   :  { %736 = vmatpush.msra.mxu3 %v581_v7  ;;  %756 = vmatpush.msrb.mxu2 %v597_v8 }
  0xfa   :  { %801 = vmatpush.msrb.mxu3 %v660_v9  ;;  %821 = vmatpush.msra.mxu2 %v676_v10  ;;  %v363_v10 = vperm.slane %v359_v61, 2 }
  0xfc   :  { %802 = vmatpush.msrb.mxu3 %v659_v11  ;;  %822 = vmatpush.msra.mxu2 %v675_v12  ;;  %v364_v11 = vperm.slane %v359_v61, 3 }
  0xfe   :  { %803 = vmatpush.msrb.mxu3 %v658_v15  ;;  %823 = vmatpush.msra.mxu2 %v674_v16 }
 0x100   :  { %804 = vmatpush.msrb.mxu3 %v657_v19  ;;  %824 = vmatpush.msra.mxu2 %v673_v20 }
 0x102   :  { %805 = vmatpush.msrb.mxu3 %v656_v23  ;;  %825 = vmatpush.msra.mxu2 %v672_v24  ;;  %v368_v23 = vperm.slane %v359_v61, 7 }
 0x104   :  { %806 = vmatpush.msrb.mxu3 %v655_v27  ;;  %826 = vmatpush.msra.mxu2 %v671_v28 }
 0x106   :  { %807 = vmatpush.msrb.mxu3 %v654_v31  ;;  %827 = vmatpush.msra.mxu2 %v670_v32 }
 0x108   :  { %808 = vmatpush.msrb.mxu3 %v653_v35  ;;  %828 = vmatpush.msra.mxu2 %v669_v36 }
 0x10a   :  { %809 = vmatpush.msrb.mxu3 %v652_v39  ;;  %829 = vmatpush.msra.mxu2 %v668_v40 }
 0x10c   :  { %810 = vmatpush.msrb.mxu3 %v651_v43  ;;  %830 = vmatpush.msra.mxu2 %v667_v44 }
 0x10e   :  { %811 = vmatpush.msrb.mxu3 %v650_v47  ;;  %831 = vmatpush.msra.mxu2 %v666_v48 }
 0x110   :  { %812 = vmatpush.msrb.mxu3 %v649_v51  ;;  %832 = vmatpush.msra.mxu2 %v665_v52 }
 0x112   :  { %813 = vmatpush.msrb.mxu3 %v648_v53  ;;  %833 = vmatpush.msra.mxu2 %v664_v54 }
 0x114   :  { %814 = vmatpush.msrb.mxu3 %v647_v55  ;;  %834 = vmatpush.msra.mxu2 %v663_v56 }
 0x116   :  { %815 = vmatpush.msrb.mxu3 %v646_v57  ;;  %835 = vmatpush.msra.mxu2 %v662_v58 }
 0x118   :  { %816 = vmatpush.msrb.mxu3 %v645_v59  ;;  %836 = vmatpush.msra.mxu2 %v661_v60 }
 0x146   :  { %v478_v8 = vpop.f32.mrf.mxu0  ;;  %v498_v9 = vpop.f32.mrf.mxu1 }
 0x147   :  { %v479_v12 = vadd.f32 %v478_v8, %v365_v4  ;;  %v499_v13 = vadd.f32 %v498_v9, %v366_v5 }
 0x149   :  { %v545_v18 = vmax.f32 %v479_v12, 0.0  ;;  %v546_v19 = vmax.f32 %v499_v13, 0.0 }
 0x14b   :  { %v398_v0 = vpop.f32.mrf.mxu3  ;;  %v418_v1 = vpop.f32.mrf.mxu2 }
 0x14c   :  { %v399_v2 = vadd.f32 %v398_v0, %v361_v62  ;;  %v419_v3 = vadd.f32 %v418_v1, %v362_v63 }
 0x14e   :  { %v541_v6 = vmax.f32 %v399_v2, 0.0  ;;  %v542_v7 = vmax.f32 %v419_v3, 0.0 }
 0x150   :  { %697 = vmatmul.f32.vlgmr.msrb.gmra.mxu0 %v541_v6  ;;  %717 = vmatmul.f32.vlgmr.msrb.gmra.mxu1 %v542_v7 }
 0x154   :  { %v438_v14 = vpop.f32.mrf.mxu3  ;;  %v458_v15 = vpop.f32.mrf.mxu2 }
 0x155   :  { %v439_v16 = vadd.f32 %v438_v14, %v363_v10  ;;  %v459_v17 = vadd.f32 %v458_v15, %v364_v11 }
 0x157   :  { %v543_v20 = vmax.f32 %v439_v16, 0.0  ;;  %v544_v21 = vmax.f32 %v459_v17, 0.0 }
 0x158   :  { %777 = vmatmul.f32.vlgmr.msra.gmra.mxu0 %v545_v18  ;;  %797 = vmatmul.f32.vlgmr.msra.gmra.mxu1 %v546_v19 }
 0x159   :  { %737 = vmatmul.f32.vlgmr.msra.gmra.mxu3 %v543_v20  ;;  %757 = vmatmul.f32.vlgmr.msrb.gmra.mxu2 %v544_v21 }
 0x15c   :  { %v518_v24 = vpop.f32.mrf.mxu3  ;;  %v538_v25 = vpop.f32.mrf.mxu2 }
 0x15d   :  { %v519_v26 = vadd.f32 %v518_v24, %v367_v22  ;;  %v539_v27 = vadd.f32 %v538_v25, %v368_v23 }
 0x15f   :  { %v547_v28 = vmax.f32 %v519_v26, 0.0  ;;  %v548_v29 = vmax.f32 %v539_v27, 0.0 }
 0x161   :  { %817 = vmatmul.f32.vlgmr.msrb.gmra.mxu3 %v547_v28  ;;  %837 = vmatmul.f32.vlgmr.msra.gmra.mxu2 %v548_v29 }
 0x1cd   :  { %v698_v31 = vpop.f32.mrf.mxu0  ;;  %v718_v33 = vpop.f32.mrf.mxu1 }
 0x1ce   :  { %v699_v32 = vadd.f32 %v870_v30, %v698_v31 }
 0x1d0   :  { %v719_v34 = vadd.f32 %v718_v33, %v699_v32 }
 0x1d5   :  { %v778_v39 = vpop.f32.mrf.mxu0  ;;  %v798_v41 = vpop.f32.mrf.mxu1 }
 0x1dc   :  { %v738_v35 = vpop.f32.mrf.mxu3  ;;  %v758_v36 = vpop.f32.mrf.mxu2 }
 0x1dd   :  { %v739_v37 = vadd.f32 %v738_v35, %v719_v34 }
 0x1df   :  { %v759_v38 = vadd.f32 %v758_v36, %v739_v37 }
 0x1e1   :  { %v779_v40 = vadd.f32 %v778_v39, %v759_v38 }
 0x1e3   :  { %v799_v42 = vadd.f32 %v798_v41, %v779_v40 }
 0x1e4   :  { %v818_v43 = vpop.f32.mrf.mxu3  ;;  %v838_v45 = vpop.f32.mrf.mxu2 }
 0x1e5   :  { %v819_v44 = vadd.f32 %v818_v43, %v799_v42 }
 0x1e7   :  { %v839_v46 = vadd.f32 %v838_v45, %v819_v44 }
 0x1e9   :  { %842 = vst.msk [vmem:[#allocation2] sm:$0x3] %vm841_vm2, %v839_v46 }
 0x1ea   :  { %853 = dma.vmem_to_hbm [thread:$0]  %s849_s14, 32, %s851_s17, [#allocation3]  }
 0x1eb   :  { %895 = dma.done.wait [#allocation3], 32  }
 0x1ec   :  { %896 = vsyncadd [#allocation3], 4294967264 }
 0x1ed   :  { %858 = vsyncpa [#allocation3], 1 }

</bundles_post_ra>
